<compile_context>
chip_gen: v6e
topology: v6e:2x2x1
jax: 0.10.0
libtpu: 0.0.40
codegen_flags: <defaults>
</compile_context>

<pallas_src>
import functools

import jax
import jax.numpy as jnp
import numpy as np
from jax import lax
from jax.experimental import pallas as pl
from jax.experimental.pallas import tpu as pltpu

DROPOUT_P = 0.2
# integer keep-threshold: drop iff bits < p * 2^32  (numpy scalar -> jaxpr literal)
_DROP_THRESHOLD = np.uint32(int(DROPOUT_P * (1 << 32)))
_KEEP_SCALE = float(1.0 / (1.0 - DROPOUT_P))


def _random_bits_u32(seed_u32, shape, row_offset_u32):
    """Counter-based splitmix32-style hash -> uint32 bits, unique per element."""
    rows = lax.broadcasted_iota(jnp.int32, shape, 0).astype(jnp.uint32)
    cols = lax.broadcasted_iota(jnp.int32, shape, 1).astype(jnp.uint32)
    flat = (rows + row_offset_u32) * np.uint32(shape[1]) + cols
    x = flat ^ (seed_u32 * np.uint32(0x9E3779B9))
    x = (x ^ (x >> 16)) * np.uint32(0x7FEB352D)
    x = (x ^ (x >> 15)) * np.uint32(0x846CA68B)
    x = x ^ (x >> 16)
    return x


def _ffwd_kernel(seed_ref, x_ref, w1_ref, b1_ref, w2_ref, b2_ref, o_ref, *,
                 training):
    # x tile arrives as bf16, so both matmuls hit the bf16 MXU path with f32
    # accumulation kept inside the MXU (no VPU accumulator chain).
    x = x_ref[...]
    h = jnp.dot(x, w1_ref[...], preferred_element_type=jnp.float32)
    h = jnp.maximum(h + b1_ref[...], 0.0)                       # bias + ReLU (f32)
    y = jnp.dot(h.astype(jnp.bfloat16), w2_ref[...],
                preferred_element_type=jnp.float32) + b2_ref[...]

    if training:
        # Inverted dropout with a pure integer compare (no uniform-float math).
        seed_u32 = seed_ref[0].astype(jnp.uint32)
        row_off = (pl.program_id(0) * o_ref.shape[0]).astype(jnp.uint32)
        bits = _random_bits_u32(seed_u32, y.shape, row_off)
        keep = bits >= _DROP_THRESHOLD
        y = jnp.where(keep, y * _KEEP_SCALE, 0.0)

    o_ref[...] = y.astype(o_ref.dtype)


def _round_up(x, m):
    return (x + m - 1) // m * m


def feed_forward(x, w1, b1, w2, b2, *, seed=0, training=False, tm=512,
                 vmem_limit_bytes=None):
    """x: (B, T, C). w1: (C, 4C), b1: (1, 4C), w2: (4C, C), b2: (1, C).

    Weights are stored (in, out) so y = x @ W + b (== PyTorch's x @ W.T + b).
    Pass bf16 weights to avoid a per-call f32->bf16 conversion pass.
    """
    B, T, C = x.shape
    H = w1.shape[1]
    M = B * T

    # Row tile: as large as sensible (amortize per-grid-step overhead) but never
    # larger than the 8-aligned row count.  Ragged last tiles are handled by
    # Pallas edge-block masking, so no jnp.pad copy of the activations.
    tm_eff = max(8, min(_round_up(tm, 8), _round_up(M, 8)))
    n_tiles = pl.cdiv(M, tm_eff)

    if training:
        # Dropout flat index is computed in uint32; keep it from wrapping.
        assert M * C < (1 << 32), "dropout counter would wrap; needs 64-bit hash"

    # bf16 activations + weights: half the HBM traffic and VMEM residency.
    x2 = x.reshape(M, C).astype(jnp.bfloat16)
    w1b = w1 if w1.dtype == jnp.bfloat16 else w1.astype(jnp.bfloat16)
    w2b = w2 if w2.dtype == jnp.bfloat16 else w2.astype(jnp.bfloat16)
    b1f = b1.astype(jnp.float32)
    b2f = b2.astype(jnp.float32)

    out_dtype = x.dtype
    out_itemsize = jnp.dtype(out_dtype).itemsize
    kernel = functools.partial(_ffwd_kernel, training=training)

    flops = 4 * M * C * H                        # two (M,C,H)-sized matmuls
    bytes_accessed = int(x2.size * 2 + w1b.size * 2 + w2b.size * 2
                         + b1f.size * 4 + b2f.size * 4 + M * C * out_itemsize)

    if vmem_limit_bytes is None:
        # Resident bf16 weights (double-buffered by default), double-buffered
        # x/out tiles, the (tm, 4C) f32 ReLU intermediate, biases, plus slack.
        # TODO(synk): mark the W1/W2 specs pipeline_mode=pl.Buffered(1) (their
        # index_map is constant) to halve resident-weight VMEM on v7x (64MiB/TC).
        weight_bytes = 2 * 2 * (w1b.size + w2b.size)
        tile_bytes = 2 * tm_eff * C * (2 + out_itemsize)
        hidden_bytes = tm_eff * H * 4
        bias_bytes = 4 * (b1f.size + b2f.size)
        needed = weight_bytes + tile_bytes + hidden_bytes + bias_bytes + (4 << 20)
        vmem_limit_bytes = min(max(needed, 32 << 20), 128 << 20)

    out = pl.pallas_call(
        kernel,
        out_shape=jax.ShapeDtypeStruct((M, C), out_dtype),
        grid_spec=pltpu.PrefetchScalarGridSpec(
            num_scalar_prefetch=1,               # dropout seed lives in SMEM
            grid=(n_tiles,),                     # tile over the token (row) axis
            in_specs=[
                pl.BlockSpec((tm_eff, C), lambda i, seed: (i, 0)),   # x tile (bf16)
                pl.BlockSpec((C, H), lambda i, seed: (0, 0)),        # W1 resident (bf16)
                pl.BlockSpec((1, H), lambda i, seed: (0, 0)),        # b1 (f32)
                pl.BlockSpec((H, C), lambda i, seed: (0, 0)),        # W2 resident (bf16)
                pl.BlockSpec((1, C), lambda i, seed: (0, 0)),        # b2 (f32)
            ],
            out_specs=pl.BlockSpec((tm_eff, C), lambda i, seed: (i, 0)),
        ),
        compiler_params=pltpu.CompilerParams(
            dimension_semantics=("parallel",),   # row tiles feed both TCs on v7x
            vmem_limit_bytes=int(vmem_limit_bytes)),
        cost_estimate=pl.CostEstimate(flops=flops, transcendentals=0,
                                      bytes_accessed=bytes_accessed),
    )(jnp.array([seed], dtype=jnp.int32), x2, w1b, b1f, w2b, b2f)

    return out.reshape(B, T, C)


def feed_forward_ref(x, w1, b1, w2, b2):
    # Pure-JAX reference matching the kernel's bf16-matmul / f32-accumulate
    # precision (eval mode: dropout is identity).
    xb = x.astype(jnp.bfloat16)
    h = jnp.dot(xb, w1.astype(jnp.bfloat16),
                preferred_element_type=jnp.float32) + b1[0].astype(jnp.float32)
    h = jnp.maximum(h, 0.0)
    y = jnp.dot(h.astype(jnp.bfloat16), w2.astype(jnp.bfloat16),
                preferred_element_type=jnp.float32) + b2[0].astype(jnp.float32)
    return y


if __name__ == "__main__":
    # Shapes consistent with the module: n_embd = 384, hidden = 4 * n_embd.
    B, T, C = 2, 8, 384
    H = 4 * C

    key = jax.random.PRNGKey(0)
    kx, k1, k2, k3, k4 = jax.random.split(key, 5)

    x = jax.random.normal(kx, (B, T, C), dtype=jnp.float32)
    # PyTorch Linear stores (out, in); we keep (in, out) so y = x @ W + b.
    w1 = jax.random.normal(k1, (C, H), dtype=jnp.float32) * (1.0 / np.sqrt(C))
    b1 = jax.random.normal(k2, (1, H), dtype=jnp.float32) * 0.01
    w2 = jax.random.normal(k3, (H, C), dtype=jnp.float32) * (1.0 / np.sqrt(H))
    b2 = jax.random.normal(k4, (1, C), dtype=jnp.float32) * 0.01

    # Convert weights to bf16 once at "parameter load" time (not per call).
    w1b = w1.astype(jnp.bfloat16)
    w2b = w2.astype(jnp.bfloat16)

    # Eval mode (dropout = identity) — check against the bf16-precision reference.
    y_eval = feed_forward(x, w1b, b1, w2b, b2, training=False)
    jax.block_until_ready(y_eval)
    y_ref = feed_forward_ref(x, w1, b1, w2, b2)
    assert y_eval.shape == (B, T, C)
    assert jnp.allclose(y_eval, y_ref, atol=2e-2, rtol=2e-2), "mismatch vs reference"

    # Training mode: fused inverted dropout (counter-based mask).
    y_train = feed_forward(x, w1b, b1, w2b, b2, seed=123, training=True)
    jax.block_until_ready(y_train)
    assert y_train.shape == (B, T, C)
    drop_frac = float(jnp.mean((y_train == 0.0).astype(jnp.float32)))
    assert 0.05 < drop_frac < 0.5, f"dropout fraction looks wrong: {drop_frac}"

    print("KERNEL_OK")
</pallas_src>

<mosaic_0001>
module attributes {stable_mosaic.version = 11 : i64} {
  func.func @_ffwd_kernel(%arg0: i32, %arg1: memref<1xi32, #tpu.memory_space<smem>>, %arg2: memref<16x384xbf16, #tpu.memory_space<vmem>>, %arg3: memref<384x1536xbf16, #tpu.memory_space<vmem>>, %arg4: memref<1x1536xf32, #tpu.memory_space<vmem>>, %arg5: memref<1536x384xbf16, #tpu.memory_space<vmem>>, %arg6: memref<1x384xf32, #tpu.memory_space<vmem>>, %arg7: memref<16x384xf32, #tpu.memory_space<vmem>>) attributes {dimension_semantics = [#tpu.dimension_semantics<parallel>], iteration_bounds = array<i64: 1>, scalar_prefetch = 1 : i64, scratch_operands = 0 : i64, tpu.core_type = #tpu.core_type<tc>, window_params = [{transform_indices = @transform_0, window_bounds = array<i64: 16, 384>}, {pipeline_mode = #tpu.pipeline_mode<synchronous>, transform_indices = @transform_1, window_bounds = array<i64: 384, 1536>}, {pipeline_mode = #tpu.pipeline_mode<synchronous>, transform_indices = @transform_2, window_bounds = array<i64: 1, 1536>}, {pipeline_mode = #tpu.pipeline_mode<synchronous>, transform_indices = @transform_3, window_bounds = array<i64: 1536, 384>}, {pipeline_mode = #tpu.pipeline_mode<synchronous>, transform_indices = @transform_4, window_bounds = array<i64: 1, 384>}, {transform_indices = @transform_5, window_bounds = array<i64: 16, 384>}]} {
    %c0 = arith.constant 0 : index
    %c0_0 = arith.constant 0 : index
    %0 = vector.load %arg2[%c0, %c0_0] : memref<16x384xbf16, #tpu.memory_space<vmem>>, vector<16x384xbf16>
    %c0_1 = arith.constant 0 : index
    %c0_2 = arith.constant 0 : index
    %1 = vector.load %arg3[%c0_1, %c0_2] : memref<384x1536xbf16, #tpu.memory_space<vmem>>, vector<384x1536xbf16>
    %cst = arith.constant dense<0.000000e+00> : vector<16x1536xf32>
    %2 = tpu.matmul %0, %1, %cst {dimension_numbers = #tpu.dot_dimension_numbers<[1], [0], [0], [1], [0, 0, 1, 1], [], []>} : vector<16x384xbf16>, vector<384x1536xbf16>, vector<16x1536xf32> -> vector<16x1536xf32>
    %c0_3 = arith.constant 0 : index
    %c0_4 = arith.constant 0 : index
    %3 = vector.load %arg4[%c0_3, %c0_4] : memref<1x1536xf32, #tpu.memory_space<vmem>>, vector<1x1536xf32>
    %4 = vector.broadcast %3 : vector<1x1536xf32> to vector<16x1536xf32>
    %5 = arith.addf %2, %4 : vector<16x1536xf32>
    %cst_5 = arith.constant 0.000000e+00 : f32
    %6 = vector.broadcast %cst_5 : f32 to vector<16x1536xf32>
    %7 = arith.maximumf %5, %6 : vector<16x1536xf32>
    %8 = arith.truncf %7 : vector<16x1536xf32> to vector<16x1536xbf16>
    %c0_6 = arith.constant 0 : index
    %c0_7 = arith.constant 0 : index
    %9 = vector.load %arg5[%c0_6, %c0_7] : memref<1536x384xbf16, #tpu.memory_space<vmem>>, vector<1536x384xbf16>
    %cst_8 = arith.constant dense<0.000000e+00> : vector<16x384xf32>
    %10 = tpu.matmul %8, %9, %cst_8 {dimension_numbers = #tpu.dot_dimension_numbers<[1], [0], [0], [1], [0, 0, 1, 1], [], []>} : vector<16x1536xbf16>, vector<1536x384xbf16>, vector<16x384xf32> -> vector<16x384xf32>
    %c0_9 = arith.constant 0 : index
    %c0_10 = arith.constant 0 : index
    %11 = vector.load %arg6[%c0_9, %c0_10] : memref<1x384xf32, #tpu.memory_space<vmem>>, vector<1x384xf32>
    %12 = vector.broadcast %11 : vector<1x384xf32> to vector<16x384xf32>
    %13 = arith.addf %10, %12 : vector<16x384xf32>
    %c0_11 = arith.constant 0 : index
    %c0_12 = arith.constant 0 : index
    %14 = vector.load %arg7[%c0_11, %c0_12] : memref<16x384xf32, #tpu.memory_space<vmem>>, vector<16x384xf32>
    tpu.vector_store %arg7[%c0_11, %c0_12], %13 {strides = array<i32>} : memref<16x384xf32, #tpu.memory_space<vmem>>, vector<16x384xf32>,
    return
  }
  func.func @transform_0(%arg0: i32, %arg1: memref<1xi32, #tpu.memory_space<smem>>) -> (i32, i32) {
    %c0_i32 = arith.constant 0 : i32
    %c0_i32_0 = arith.constant 0 : i32
    return %arg0, %c0_i32 : i32, i32
  }
  func.func @transform_1(%arg0: i32, %arg1: memref<1xi32, #tpu.memory_space<smem>>) -> (i32, i32) {
    %c0_i32 = arith.constant 0 : i32
    %c0_i32_0 = arith.constant 0 : i32
    %c0_i32_1 = arith.constant 0 : i32
    return %c0_i32, %c0_i32_0 : i32, i32
  }
  func.func @transform_2(%arg0: i32, %arg1: memref<1xi32, #tpu.memory_space<smem>>) -> (i32, i32) {
    %c0_i32 = arith.constant 0 : i32
    %c0_i32_0 = arith.constant 0 : i32
    %c0_i32_1 = arith.constant 0 : i32
    return %c0_i32, %c0_i32_0 : i32, i32
  }
  func.func @transform_3(%arg0: i32, %arg1: memref<1xi32, #tpu.memory_space<smem>>) -> (i32, i32) {
    %c0_i32 = arith.constant 0 : i32
    %c0_i32_0 = arith.constant 0 : i32
    %c0_i32_1 = arith.constant 0 : i32
    return %c0_i32, %c0_i32_0 : i32, i32
  }
  func.func @transform_4(%arg0: i32, %arg1: memref<1xi32, #tpu.memory_space<smem>>) -> (i32, i32) {
    %c0_i32 = arith.constant 0 : i32
    %c0_i32_0 = arith.constant 0 : i32
    %c0_i32_1 = arith.constant 0 : i32
    return %c0_i32, %c0_i32_0 : i32, i32
  }
  func.func @transform_5(%arg0: i32, %arg1: memref<1xi32, #tpu.memory_space<smem>>) -> (i32, i32) {
    %c0_i32 = arith.constant 0 : i32
    %c0_i32_0 = arith.constant 0 : i32
    return %arg0, %c0_i32 : i32, i32
  }
}

</mosaic_0001>

<bundles_post_ra>
// kernel: tpu_custom_call.1
= control target key start
LH: loop header
LB: loop body
LE: loop exit
PB: predicated region body
PF: predicated region fallthrough
CT: control target
= control target key end

     0   :  { %12 = vsyncpa [#allocation5], 0  ;;  %s6827_s0 = inlined_call_operand.<no memory space> [shape: s32[1], index: 0, kind: input, shape index: {}]   ;;  %s6828_s1 = inlined_call_operand.hbm [shape: bf16[16,384], index: 1, kind: input, shape index: {}]   ;;  %s6829_s2 = inlined_call_operand.hbm [shape: bf16[384,1536], index: 2, kind: input, shape index: {}]   ;;  %s6830_s3 = inlined_call_operand.hbm [shape: f32[1,1536], index: 3, kind: input, shape index: {}]   ;;  %s6831_s4 = inlined_call_operand.hbm [shape: bf16[1536,384], index: 4, kind: input, shape index: {}]   ;;  %s6832_s5 = inlined_call_operand.hbm [shape: f32[1,384], index: 5, kind: input, shape index: {}]   ;;  %s6833_s6 = inlined_call_operand.hbm [shape: f32[16,384], index: 6, kind: output, shape index: {}]  }
   0x1   :  { %13 = vsyncpa [#allocation8], 0 }
   0x2   :  { %14 = vsyncpa [#allocation11], 0 }
   0x3   :  { %15 = vsyncpa [#allocation6], 0  ;;  %s6594_s0 = smov [#allocation7]  }
   0x4   :  { %s33_s21 = sshll.u32 %s6594_s0, 4  ;;  %s34_s21 = int_to_ptr.vmem [resolvable:$true] %s33_s21 }
   0x5   :  { %s6474_s22 = scalar_lea.vmem %s34_s21, 36864  ;;  %p6479_p1 = scmp.lt.s32.totalorder %s34_s21, %s34_s21 }
   0x6   :  { %p6475_p0 = scmp.ne.s32.totalorder %s34_s21, %s6474_s22  ;;  %p6480_p2 = scmp.lt.s32.totalorder %s6474_s22, %s6474_s22 }
   0x8   :  { %p6481_p3 = por %p6480_p2, %p6479_p1 }
   0xa   :  { %p6482_p4 = pnand %p6481_p3, %p6475_p0 }
   0xc   :  { %6485 = shalt.err (!%p6482_p4)
}
   0xd   :  { %s6595_s23 = smov 768   ;;  %s6596_s24 = smov 48  }
   0xe   :  { %39 = dma.hbm_to_vmem [thread:$0]  %s6829_s2, 36864, %s34_s21, [#allocation8], %s6595_s23, %s6595_s23, %s6596_s24  }
   0xf   :  { %s6597_s27 = smov [#allocation10]   ;;  %s6598_s29 = smov [#allocation4]  }
  0x10   :  { %s55_s28 = sshll.u32 %s6597_s27, 4  ;;  %s21_s30 = sshll.u32 %s6598_s29, 4  ;;  %s56_s28 = int_to_ptr.vmem [resolvable:$true] %s55_s28  ;;  %s22_s30 = int_to_ptr.vmem [resolvable:$true] %s21_s30 }
  0x11   :  { %s6494_s7 = scalar_lea.vmem %s56_s28, 36864  ;;  %p6499_p6 = scmp.lt.s32.totalorder %s56_s28, %s56_s28 }
  0x12   :  { %p6495_p5 = scmp.ne.s32.totalorder %s56_s28, %s6494_s7  ;;  %p6500_p7 = scmp.lt.s32.totalorder %s6494_s7, %s6494_s7 }
  0x14   :  { %p6501_p8 = por %p6500_p7, %p6499_p6 }
  0x16   :  { %p6502_p9 = pnand %p6501_p8, %p6495_p5 }
  0x18   :  { %6505 = shalt.err (!%p6502_p9)
}
  0x19   :  { %s6599_s8 = smov 192   ;;  %s6600_s9 = smov 12  }
  0x1a   :  { %61 = dma.hbm_to_vmem [thread:$0]  %s6831_s4, 36864, %s56_s28, [#allocation11], %s6599_s8, %s6599_s8, %s6600_s9  }
  0x1b   :  { %s6514_s2 = scalar_lea.vmem %s22_s30, 384  ;;  %p6519_p11 = scmp.lt.s32.totalorder %s22_s30, %s22_s30 }
  0x1c   :  { %p6515_p10 = scmp.ne.s32.totalorder %s22_s30, %s6514_s2  ;;  %p6520_p12 = scmp.lt.s32.totalorder %s6514_s2, %s6514_s2 }
  0x1e   :  { %p6521_p13 = por %p6520_p12, %p6519_p11 }
  0x20   :  { %p6522_p0 = pnand %p6521_p13, %p6515_p10 }
  0x22   :  { %6525 = shalt.err (!%p6522_p0)
}
  0x23   :  { %27 = dma.hbm_to_vmem [thread:$0]  %s6828_s1, 384, %s22_s30, [#allocation5], %s6599_s8, %s6599_s8, %s6600_s9  }
  0x24   :  { %s6601_s14 = smov [#allocation9]   ;;  %s6602_s16 = smov [#allocation12]  }
  0x25   :  { %s46_s15 = sshll.u32 %s6601_s14, 4  ;;  %s68_s17 = sshll.u32 %s6602_s16, 4  ;;  %s47_s15 = int_to_ptr.vmem [resolvable:$true] %s46_s15  ;;  %s69_s17 = int_to_ptr.vmem [resolvable:$true] %s68_s17 }
  0x26   :  { %s6534_s18 = scalar_lea.vmem %s47_s15, 192  ;;  %p6539_p2 = scmp.lt.s32.totalorder %s47_s15, %s47_s15 }
  0x27   :  { %p6535_p1 = scmp.ne.s32.totalorder %s47_s15, %s6534_s18  ;;  %p6540_p3 = scmp.lt.s32.totalorder %s6534_s18, %s6534_s18 }
  0x29   :  { %p6541_p4 = por %p6540_p3, %p6539_p2 }
  0x2b   :  { %p6542_p5 = pnand %p6541_p4, %p6535_p1 }
  0x2d   :  { %6545 = shalt.err (!%p6542_p5)
}
  0x2e   :  { %49 = dma.hbm_to_vmem [thread:$0]  %s6830_s3, 192, %s47_s15, [#allocation8]  }
  0x2f   :  { %s6554_s20 = scalar_lea.vmem %s69_s17, 48  ;;  %s6558_s1 = scalar_lea.vmem %s69_s17, 64 }
  0x30   :  { %p6555_p6 = scmp.ne.s32.totalorder %s69_s17, %s6554_s20  ;;  %p6559_p7 = scmp.lt.s32.totalorder %s69_s17, %s69_s17 }
  0x31   :  { %p6560_p8 = scmp.lt.s32.totalorder %s6558_s1, %s6554_s20 }
  0x33   :  { %p6561_p9 = por %p6560_p8, %p6559_p7 }
  0x35   :  { %p6562_p10 = pnand %p6561_p9, %p6555_p6 }
  0x37   :  { %6565 = shalt.err (!%p6562_p10)
}
  0x38   :  { %71 = dma.hbm_to_vmem [thread:$0]  %s6832_s5, 48, %s69_s17, [#allocation11]  }
  0x39   :  { %6586 = dma.done.wait [#allocation5], 384  }
  0x3a   :  { %6587 = vsyncadd [#allocation5], 4294966912 }
  0x3b   :  { %6588 = dma.done.wait [#allocation8], 37056  }
  0x3c   :  { %6589 = vsyncadd [#allocation8], 4294930240 }
  0x3d   :  { %6590 = dma.done.wait [#allocation11], 36912  }
  0x3e   :  { %6591 = vsyncadd [#allocation11], 4294930384  ;;  %v6603_v0 = vmov 0   ;;  %v5642_v1 = vld [vmem:[#allocation7 + $0x2a4] ss:$48 sps:$4 sm:$0xff]   ;;  %s6604_s3 = smov [#allocation13]  }
  0x3f   :  { %1975 = vmatprep.mubr.bf16.mxu1 %v6603_v0  ;;  %v5644_v2 = vld [vmem:[#allocation7 + $0x8a4] ss:$48 sps:$4 sm:$0xff]   ;;  %1900 = vmatprep.subr.bf16.mxu0 %v5642_v1  ;;  %v5646_v3 = vld [vmem:[#allocation7 + $0x2a0] ss:$48 sps:$4 sm:$0xff]   ;;  %v5695_v34 = vld [vmem:[#allocation7 + $0x2ac] ss:$48 sps:$4 sm:$0xff]  }
  0x40   :  { %v5647_v4 = vld [vmem:[#allocation7 + $0x8a0] ss:$48 sps:$4 sm:$0xff]   ;;  %1943 = vmatprep.subr.bf16.mxu1 %v5644_v2  ;;  %v5648_v5 = vld [vmem:[#allocation7 + $0x244] ss:$48 sps:$4 sm:$0xff]   ;;  %1901 = vmatpush1.bf16.msra.mxu0 %v5646_v3  ;;  %v5693_v36 = vld [vmem:[#allocation7 + $0x2a8] ss:$48 sps:$4 sm:$0xff]  }
  0x41   :  { %1944 = vmatpush1.bf16.msra.mxu1 %v5647_v4  ;;  %v5650_v6 = vld [vmem:[#allocation7 + $0x844] ss:$48 sps:$4 sm:$0xff]   ;;  %v5652_v7 = vld [vmem:[#allocation7 + $0x240] ss:$48 sps:$4 sm:$0xff]   ;;  %1902 = vmatprep.subr.bf16.mxu0 %v5648_v5  ;;  %v5701_v39 = vld [vmem:[#allocation7 + $0x24c] ss:$48 sps:$4 sm:$0xff]  }
  0x42   :  { %v5653_v8 = vld [vmem:[#allocation7 + $0x840] ss:$48 sps:$4 sm:$0xff]   ;;  %1945 = vmatprep.subr.bf16.mxu1 %v5650_v6  ;;  %v5654_v9 = vld [vmem:[#allocation7 + $0x1e4] ss:$48 sps:$4 sm:$0xff]   ;;  %v5699_v40 = vld [vmem:[#allocation7 + $0x248] ss:$48 sps:$4 sm:$0xff]  }
  0x43   :  { %v5656_v10 = vld [vmem:[#allocation7 + $0x7e4] ss:$48 sps:$4 sm:$0xff]   ;;  %v5658_v11 = vld [vmem:[#allocation7 + $0x1e0] ss:$48 sps:$4 sm:$0xff]   ;;  %v5707_v43 = vld [vmem:[#allocation7 + $0x1ec] ss:$48 sps:$4 sm:$0xff]  }
  0x44   :  { %v5659_v12 = vld [vmem:[#allocation7 + $0x7e0] ss:$48 sps:$4 sm:$0xff]   ;;  %1903 = vmatpush1.bf16.msra.mxu0 %v5652_v7  ;;  %v5660_v13 = vld [vmem:[#allocation7 + $0x184] ss:$48 sps:$4 sm:$0xff]   ;;  %v5705_v44 = vld [vmem:[#allocation7 + $0x1e8] ss:$48 sps:$4 sm:$0xff]  }
  0x45   :  { %1946 = vmatpush1.bf16.msra.mxu1 %v5653_v8  ;;  %1904 = vmatprep.subr.bf16.mxu0 %v5654_v9  ;;  %v5662_v14 = vld [vmem:[#allocation7 + $0x784] ss:$48 sps:$4 sm:$0xff]   ;;  %v5664_v15 = vld [vmem:[#allocation7 + $0x180] ss:$48 sps:$4 sm:$0xff]   ;;  %v5713_v47 = vld [vmem:[#allocation7 + $0x18c] ss:$48 sps:$4 sm:$0xff]  }
  0x46   :  { %1947 = vmatprep.subr.bf16.mxu1 %v5656_v10  ;;  %v5665_v16 = vld [vmem:[#allocation7 + $0x780] ss:$48 sps:$4 sm:$0xff]   ;;  %v5666_v17 = vld [vmem:[#allocation7 + $0x124] ss:$48 sps:$4 sm:$0xff]   ;;  %v5711_v48 = vld [vmem:[#allocation7 + $0x188] ss:$48 sps:$4 sm:$0xff]  }
  0x47   :  { %v5668_v18 = vld [vmem:[#allocation7 + $0x724] ss:$48 sps:$4 sm:$0xff]   ;;  %v5670_v19 = vld [vmem:[#allocation7 + $0x120] ss:$48 sps:$4 sm:$0xff]   ;;  %v6661_v51 = vld [vmem:[#allocation4 + $0x4] ss:$12 sps:$4 sm:$0xff]  }
  0x48   :  { %1905 = vmatpush1.bf16.msra.mxu0 %v5658_v11  ;;  %v5671_v20 = vld [vmem:[#allocation7 + $0x720] ss:$48 sps:$4 sm:$0xff]   ;;  %v5672_v21 = vld [vmem:[#allocation7 + $0xc4] ss:$48 sps:$4 sm:$0xff]   ;;  %v5719_v52 = vld [vmem:[#allocation7 + $0x12c] ss:$48 sps:$4 sm:$0xff]   ;;  %1932 = vmatprep.mubr.bf16.mxu0 %v6661_v51 }
  0x49   :  { %1948 = vmatpush1.bf16.msra.mxu1 %v5659_v12  ;;  %1906 = vmatprep.subr.bf16.mxu0 %v5660_v13  ;;  %v5674_v22 = vld [vmem:[#allocation7 + $0x6c4] ss:$48 sps:$4 sm:$0xff]   ;;  %v5676_v23 = vld [vmem:[#allocation7 + $0xc0] ss:$48 sps:$4 sm:$0xff]   ;;  %v5717_v53 = vld [vmem:[#allocation7 + $0x128] ss:$48 sps:$4 sm:$0xff]  }
  0x4a   :  { %1949 = vmatprep.subr.bf16.mxu1 %v5662_v14  ;;  %v5677_v24 = vld [vmem:[#allocation7 + $0x6c0] ss:$48 sps:$4 sm:$0xff]   ;;  %v5678_v25 = vld [vmem:[#allocation7 + $0x64] ss:$48 sps:$4 sm:$0xff]   ;;  %v5725_v56 = vld [vmem:[#allocation7 + $0xcc] ss:$48 sps:$4 sm:$0xff]  }
  0x4b   :  { %v5680_v26 = vld [vmem:[#allocation7 + $0x664] ss:$48 sps:$4 sm:$0xff]   ;;  %v5682_v27 = vld [vmem:[#allocation7 + $0x60] ss:$48 sps:$4 sm:$0xff]   ;;  %v5723_v57 = vld [vmem:[#allocation7 + $0xc8] ss:$48 sps:$4 sm:$0xff]  }
  0x4c   :  { %1907 = vmatpush1.bf16.msra.mxu0 %v5664_v15  ;;  %v5683_v28 = vld [vmem:[#allocation7 + $0x660] ss:$48 sps:$4 sm:$0xff]   ;;  %v5684_v29 = vld [vmem:[#allocation7 + $0x4] ss:$48 sps:$4 sm:$0xff]   ;;  %v5731_v60 = vld [vmem:[#allocation7 + $0x6c] ss:$48 sps:$4 sm:$0xff]  }
  0x4d   :  { %1950 = vmatpush1.bf16.msra.mxu1 %v5665_v16  ;;  %1908 = vmatprep.subr.bf16.mxu0 %v5666_v17  ;;  %v5686_v30 = vld [vmem:[#allocation7 + $0x604] ss:$48 sps:$4 sm:$0xff]   ;;  %v5688_v31 = vld [vmem:[#allocation7] ss:$48 sps:$4 sm:$0xff]   ;;  %v5729_v61 = vld [vmem:[#allocation7 + $0x68] ss:$48 sps:$4 sm:$0xff]  }
  0x4e   :  { %1951 = vmatprep.subr.bf16.mxu1 %v5668_v18  ;;  %v5689_v32 = vld [vmem:[#allocation7 + $0x600] ss:$48 sps:$4 sm:$0xff]   ;;  %v5690_v33 = vld [vmem:[#allocation7 + $0x5a4] ss:$48 sps:$4 sm:$0xff]   ;;  %v5737_v1 = vld [vmem:[#allocation7 + $0xc] ss:$48 sps:$4 sm:$0xff]  }
  0x4f   :  { %v6658_v35 = vld [vmem:[#allocation4 + $0x8] ss:$12 sps:$4 sm:$0xff]   ;;  %v5697_v38 = vld [vmem:[#allocation7 + $0x544] ss:$48 sps:$4 sm:$0xff]   ;;  %v5735_v2 = vld [vmem:[#allocation7 + $0x8] ss:$48 sps:$4 sm:$0xff]  }
  0x50   :  { %1909 = vmatpush1.bf16.msra.mxu0 %v5670_v19  ;;  %v5696_v37 = vld [vmem:[#allocation7 + $0x5a0] ss:$48 sps:$4 sm:$0xff]   ;;  %v5703_v42 = vld [vmem:[#allocation7 + $0x4e4] ss:$48 sps:$4 sm:$0xff]   ;;  %v5744_v4 = vld [vmem:[#allocation7 + $0x5ac] ss:$48 sps:$4 sm:$0xff]  }
  0x51   :  { %1952 = vmatpush1.bf16.msra.mxu1 %v5671_v20  ;;  %1910 = vmatprep.subr.bf16.mxu0 %v5672_v21  ;;  %v5702_v41 = vld [vmem:[#allocation7 + $0x540] ss:$48 sps:$4 sm:$0xff]   ;;  %v5709_v46 = vld [vmem:[#allocation7 + $0x484] ss:$48 sps:$4 sm:$0xff]   ;;  %v5747_v5 = vld [vmem:[#allocation7 + $0x8ac] ss:$48 sps:$4 sm:$0xff]  }
  0x52   :  { %1953 = vmatprep.subr.bf16.mxu1 %v5674_v22  ;;  %v5708_v45 = vld [vmem:[#allocation7 + $0x4e0] ss:$48 sps:$4 sm:$0xff]   ;;  %v5715_v50 = vld [vmem:[#allocation7 + $0x424] ss:$48 sps:$4 sm:$0xff]   ;;  %v5742_v7 = vld [vmem:[#allocation7 + $0x5a8] ss:$48 sps:$4 sm:$0xff]  }
  0x53   :  { %v5714_v49 = vld [vmem:[#allocation7 + $0x480] ss:$48 sps:$4 sm:$0xff]   ;;  %v5721_v55 = vld [vmem:[#allocation7 + $0x3c4] ss:$48 sps:$4 sm:$0xff]   ;;  %v5745_v8 = vld [vmem:[#allocation7 + $0x8a8] ss:$48 sps:$4 sm:$0xff]  }
  0x54   :  { %1911 = vmatpush1.bf16.msra.mxu0 %v5676_v23  ;;  %v5720_v54 = vld [vmem:[#allocation7 + $0x420] ss:$48 sps:$4 sm:$0xff]   ;;  %v5727_v59 = vld [vmem:[#allocation7 + $0x364] ss:$48 sps:$4 sm:$0xff]   ;;  %v5750_v9 = vld [vmem:[#allocation7 + $0x54c] ss:$48 sps:$4 sm:$0xff]  }
  0x55   :  { %1954 = vmatpush1.bf16.msra.mxu1 %v5677_v24  ;;  %1912 = vmatprep.subr.bf16.mxu0 %v5678_v25  ;;  %v5726_v58 = vld [vmem:[#allocation7 + $0x3c0] ss:$48 sps:$4 sm:$0xff]   ;;  %v5733_v63 = vld [vmem:[#allocation7 + $0x304] ss:$48 sps:$4 sm:$0xff]   ;;  %v5753_v10 = vld [vmem:[#allocation7 + $0x84c] ss:$48 sps:$4 sm:$0xff]  }
  0x56   :  { %1955 = vmatprep.subr.bf16.mxu1 %v5680_v26  ;;  %v5732_v62 = vld [vmem:[#allocation7 + $0x360] ss:$48 sps:$4 sm:$0xff]   ;;  %v6665_v6 = vld [vmem:[#allocation4] ss:$12 sps:$4 sm:$0xff]   ;;  %v5756_v13 = vld [vmem:[#allocation7 + $0x4ec] ss:$48 sps:$4 sm:$0xff]  }
  0x57   :  { %v5738_v3 = vld [vmem:[#allocation7 + $0x300] ss:$48 sps:$4 sm:$0xff]   ;;  %v5748_v11 = vld [vmem:[#allocation7 + $0x548] ss:$48 sps:$4 sm:$0xff]   ;;  %v5759_v14 = vld [vmem:[#allocation7 + $0x7ec] ss:$48 sps:$4 sm:$0xff]  }
  0x58   :  { %1913 = vmatpush1.bf16.msra.mxu0 %v5682_v27  ;;  %v5751_v12 = vld [vmem:[#allocation7 + $0x848] ss:$48 sps:$4 sm:$0xff]   ;;  %v5762_v17 = vld [vmem:[#allocation7 + $0x48c] ss:$48 sps:$4 sm:$0xff]   ;;  %s4904_s5 = sshll.u32 %s6604_s3, 4  ;;  %s4905_s5 = int_to_ptr.vmem [resolvable:$true] %s4904_s5 }
  0x59   :  { %1956 = vmatpush1.bf16.msra.mxu1 %v5683_v28  ;;  %1914 = vmatprep.subr.bf16.mxu0 %v5684_v29  ;;  %v5754_v15 = vld [vmem:[#allocation7 + $0x4e8] ss:$48 sps:$4 sm:$0xff]   ;;  %v5765_v18 = vld [vmem:[#allocation7 + $0x78c] ss:$48 sps:$4 sm:$0xff]   ;;  %s6566_s22 = scalar_lea.vmem %s4905_s5, 768  ;;  %p6571_p12 = scmp.lt.s32.totalorder %s4905_s5, %s4905_s5 }
  0x5a   :  { %1957 = vmatprep.subr.bf16.mxu1 %v5686_v30  ;;  %v5757_v16 = vld [vmem:[#allocation7 + $0x7e8] ss:$48 sps:$4 sm:$0xff]   ;;  %v5768_v21 = vld [vmem:[#allocation7 + $0x42c] ss:$48 sps:$4 sm:$0xff]   ;;  %p6567_p11 = scmp.ne.s32.totalorder %s4905_s5, %s6566_s22  ;;  %p6572_p13 = scmp.lt.s32.totalorder %s6566_s22, %s6566_s22 }
  0x5b   :  { %v5760_v19 = vld [vmem:[#allocation7 + $0x488] ss:$48 sps:$4 sm:$0xff]   ;;  %v5771_v22 = vld [vmem:[#allocation7 + $0x72c] ss:$48 sps:$4 sm:$0xff]  }
  0x5c   :  { %1915 = vmatpush1.bf16.msra.mxu0 %v5688_v31  ;;  %v5763_v20 = vld [vmem:[#allocation7 + $0x788] ss:$48 sps:$4 sm:$0xff]   ;;  %v5774_v25 = vld [vmem:[#allocation7 + $0x3cc] ss:$48 sps:$4 sm:$0xff]   ;;  %p6573_p0 = por %p6572_p13, %p6571_p12 }
  0x5d   :  { %1958 = vmatpush1.bf16.msra.mxu1 %v5689_v32  ;;  %1916 = vmatprep.subr.bf16.mxu0 %v5690_v33  ;;  %v5766_v23 = vld [vmem:[#allocation7 + $0x428] ss:$48 sps:$4 sm:$0xff]   ;;  %v5777_v26 = vld [vmem:[#allocation7 + $0x6cc] ss:$48 sps:$4 sm:$0xff]  }
  0x5e   :  { %1986 = vmatprep.subr.bf16.mxu1 %v5695_v34  ;;  %v5769_v24 = vld [vmem:[#allocation7 + $0x728] ss:$48 sps:$4 sm:$0xff]   ;;  %v5780_v29 = vld [vmem:[#allocation7 + $0x36c] ss:$48 sps:$4 sm:$0xff]   ;;  %p6574_p1 = pnand %p6573_p0, %p6567_p11 }
  0x5f   :  { %v5772_v27 = vld [vmem:[#allocation7 + $0x3c8] ss:$48 sps:$4 sm:$0xff]   ;;  %v5783_v30 = vld [vmem:[#allocation7 + $0x66c] ss:$48 sps:$4 sm:$0xff]  }
  0x60   :  { %1976 = vmatmul.mubr.bf16.vlgmr.msra.gmra.mxu1 %v6658_v35  ;;  %1917 = vmatpush2.bf16.msra.mxu0 %v5696_v37  ;;  %v5775_v28 = vld [vmem:[#allocation7 + $0x6c8] ss:$48 sps:$4 sm:$0xff]   ;;  %v5786_v33 = vld [vmem:[#allocation7 + $0x30c] ss:$48 sps:$4 sm:$0xff]  }
  0x61   :  { %1987 = vmatpush1.bf16.msra.mxu1 %v5693_v36  ;;  %1918 = vmatprep.subr.bf16.mxu0 %v5697_v38  ;;  %v5778_v31 = vld [vmem:[#allocation7 + $0x368] ss:$48 sps:$4 sm:$0xff]   ;;  %v5789_v34 = vld [vmem:[#allocation7 + $0x60c] ss:$48 sps:$4 sm:$0xff]   ;;  %v5792_v38 = vld [vmem:[#allocation7 + $0x2b4] ss:$48 sps:$4 sm:$0xff]  }
  0x62   :  { %1988 = vmatprep.subr.bf16.mxu1 %v5701_v39  ;;  %2018 = vmatprep.mubr.bf16.mxu1 %v6661_v51  ;;  %v5781_v32 = vld [vmem:[#allocation7 + $0x668] ss:$48 sps:$4 sm:$0xff]   ;;  %v5795_v39 = vld [vmem:[#allocation7 + $0x8b4] ss:$48 sps:$4 sm:$0xff]  }
  0x63   :  { %v5784_v36 = vld [vmem:[#allocation7 + $0x308] ss:$48 sps:$4 sm:$0xff]  }
  0x64   :  { %1919 = vmatpush2.bf16.msra.mxu0 %v5702_v41  ;;  %v5787_v37 = vld [vmem:[#allocation7 + $0x608] ss:$48 sps:$4 sm:$0xff]   ;;  %v5793_v41 = vld [vmem:[#allocation7 + $0x8b0] ss:$48 sps:$4 sm:$0xff]  }
  0x65   :  { %1989 = vmatpush1.bf16.msra.mxu1 %v5699_v40  ;;  %1920 = vmatprep.subr.bf16.mxu0 %v5703_v42  ;;  %v5790_v40 = vld [vmem:[#allocation7 + $0x2b0] ss:$48 sps:$4 sm:$0xff]   ;;  %v5798_v42 = vld [vmem:[#allocation7 + $0x254] ss:$48 sps:$4 sm:$0xff]  }
  0x66   :  { %1990 = vmatprep.subr.bf16.mxu1 %v5707_v43  ;;  %v5801_v43 = vld [vmem:[#allocation7 + $0x854] ss:$48 sps:$4 sm:$0xff]  }
  0x68   :  { %1921 = vmatpush2.bf16.msra.mxu0 %v5708_v45  ;;  %v5799_v45 = vld [vmem:[#allocation7 + $0x850] ss:$48 sps:$4 sm:$0xff]  }
  0x69   :  { %1991 = vmatpush1.bf16.msra.mxu1 %v5705_v44  ;;  %1922 = vmatprep.subr.bf16.mxu0 %v5709_v46  ;;  %v5796_v44 = vld [vmem:[#allocation7 + $0x250] ss:$48 sps:$4 sm:$0xff]   ;;  %v5804_v46 = vld [vmem:[#allocation7 + $0x1f4] ss:$48 sps:$4 sm:$0xff]  }
  0x6a   :  { %1992 = vmatprep.subr.bf16.mxu1 %v5713_v47  ;;  %v5807_v47 = vld [vmem:[#allocation7 + $0x7f4] ss:$48 sps:$4 sm:$0xff]  }
  0x6c   :  { %1923 = vmatpush2.bf16.msra.mxu0 %v5714_v49  ;;  %v5805_v49 = vld [vmem:[#allocation7 + $0x7f0] ss:$48 sps:$4 sm:$0xff]  }
  0x6d   :  { %1993 = vmatpush1.bf16.msra.mxu1 %v5711_v48  ;;  %1924 = vmatprep.subr.bf16.mxu0 %v5715_v50  ;;  %v5802_v48 = vld [vmem:[#allocation7 + $0x1f0] ss:$48 sps:$4 sm:$0xff]   ;;  %v5810_v50 = vld [vmem:[#allocation7 + $0x194] ss:$48 sps:$4 sm:$0xff]  }
  0x6e   :  { %1994 = vmatprep.subr.bf16.mxu1 %v5719_v52  ;;  %v5813_v52 = vld [vmem:[#allocation7 + $0x794] ss:$48 sps:$4 sm:$0xff]  }
  0x70   :  { %1925 = vmatpush2.bf16.msra.mxu0 %v5720_v54  ;;  %v5811_v54 = vld [vmem:[#allocation7 + $0x790] ss:$48 sps:$4 sm:$0xff]  }
  0x71   :  { %1995 = vmatpush1.bf16.msra.mxu1 %v5717_v53  ;;  %1926 = vmatprep.subr.bf16.mxu0 %v5721_v55  ;;  %v5808_v53 = vld [vmem:[#allocation7 + $0x190] ss:$48 sps:$4 sm:$0xff]   ;;  %v5816_v55 = vld [vmem:[#allocation7 + $0x134] ss:$48 sps:$4 sm:$0xff]  }
  0x72   :  { %1996 = vmatprep.subr.bf16.mxu1 %v5725_v56  ;;  %v5819_v56 = vld [vmem:[#allocation7 + $0x734] ss:$48 sps:$4 sm:$0xff]  }
  0x74   :  { %1927 = vmatpush2.bf16.msra.mxu0 %v5726_v58  ;;  %v5817_v58 = vld [vmem:[#allocation7 + $0x730] ss:$48 sps:$4 sm:$0xff]  }
  0x75   :  { %1997 = vmatpush1.bf16.msra.mxu1 %v5723_v57  ;;  %1928 = vmatprep.subr.bf16.mxu0 %v5727_v59  ;;  %v5814_v57 = vld [vmem:[#allocation7 + $0x130] ss:$48 sps:$4 sm:$0xff]   ;;  %v5822_v59 = vld [vmem:[#allocation7 + $0xd4] ss:$48 sps:$4 sm:$0xff]  }
  0x76   :  { %1998 = vmatprep.subr.bf16.mxu1 %v5731_v60  ;;  %v5825_v60 = vld [vmem:[#allocation7 + $0x6d4] ss:$48 sps:$4 sm:$0xff]  }
  0x78   :  { %1929 = vmatpush2.bf16.msra.mxu0 %v5732_v62  ;;  %v5823_v62 = vld [vmem:[#allocation7 + $0x6d0] ss:$48 sps:$4 sm:$0xff]  }
  0x79   :  { %1999 = vmatpush1.bf16.msra.mxu1 %v5729_v61  ;;  %1930 = vmatprep.subr.bf16.mxu0 %v5733_v63  ;;  %v5820_v61 = vld [vmem:[#allocation7 + $0xd0] ss:$48 sps:$4 sm:$0xff]   ;;  %v5828_v63 = vld [vmem:[#allocation7 + $0x74] ss:$48 sps:$4 sm:$0xff]  }
  0x7a   :  { %2000 = vmatprep.subr.bf16.mxu1 %v5737_v1  ;;  %v5831_v1 = vld [vmem:[#allocation7 + $0x674] ss:$48 sps:$4 sm:$0xff]  }
  0x7c   :  { %1931 = vmatpush2.bf16.msra.mxu0 %v5738_v3  ;;  %v5829_v3 = vld [vmem:[#allocation7 + $0x670] ss:$48 sps:$4 sm:$0xff]  }
  0x7d   :  { %2001 = vmatpush1.bf16.msra.mxu1 %v5735_v2  ;;  %2029 = vmatprep.subr.bf16.mxu0 %v5747_v5  ;;  %v5826_v2 = vld [vmem:[#allocation7 + $0x70] ss:$48 sps:$4 sm:$0xff]   ;;  %v5837_v5 = vld [vmem:[#allocation7 + $0x614] ss:$48 sps:$4 sm:$0xff]  }
  0x7e   :  { %2002 = vmatprep.subr.bf16.mxu1 %v5744_v4  ;;  %v5834_v4 = vld [vmem:[#allocation7 + $0x14] ss:$48 sps:$4 sm:$0xff]  }
  0x7f   :  { %1933 = vmatmul.mubr.bf16.vlgmr.msra.gmra.mxu0 %v6665_v6 }
  0x80   :  { %2030 = vmatpush1.bf16.msra.mxu0 %v5745_v8  ;;  %2061 = vmatprep.mubr.bf16.mxu0 %v6603_v0  ;;  %v5835_v8 = vld [vmem:[#allocation7 + $0x610] ss:$48 sps:$4 sm:$0xff]  }
  0x81   :  { %2003 = vmatpush2.bf16.msra.mxu1 %v5742_v7  ;;  %2031 = vmatprep.subr.bf16.mxu0 %v5753_v10  ;;  %v5832_v7 = vld [vmem:[#allocation7 + $0x10] ss:$48 sps:$4 sm:$0xff]   ;;  %v5843_v10 = vld [vmem:[#allocation7 + $0x2bc] ss:$48 sps:$4 sm:$0xff]  }
  0x82   :  { %2004 = vmatprep.subr.bf16.mxu1 %v5750_v9  ;;  %v5840_v9 = vld [vmem:[#allocation7 + $0x5b4] ss:$48 sps:$4 sm:$0xff]  }
  0x84   :  { %2032 = vmatpush1.bf16.msra.mxu0 %v5751_v12  ;;  %v5841_v12 = vld [vmem:[#allocation7 + $0x2b8] ss:$48 sps:$4 sm:$0xff]  }
  0x85   :  { %2005 = vmatpush2.bf16.msra.mxu1 %v5748_v11  ;;  %2033 = vmatprep.subr.bf16.mxu0 %v5759_v14  ;;  %v5838_v11 = vld [vmem:[#allocation7 + $0x5b0] ss:$48 sps:$4 sm:$0xff]   ;;  %v5849_v14 = vld [vmem:[#allocation7 + $0x25c] ss:$48 sps:$4 sm:$0xff]  }
  0x86   :  { %2006 = vmatprep.subr.bf16.mxu1 %v5756_v13  ;;  %v5846_v13 = vld [vmem:[#allocation7 + $0x554] ss:$48 sps:$4 sm:$0xff]  }
  0x88   :  { %2034 = vmatpush1.bf16.msra.mxu0 %v5757_v16  ;;  %v5847_v16 = vld [vmem:[#allocation7 + $0x258] ss:$48 sps:$4 sm:$0xff]  }
  0x89   :  { %2007 = vmatpush2.bf16.msra.mxu1 %v5754_v15  ;;  %2035 = vmatprep.subr.bf16.mxu0 %v5765_v18  ;;  %v5844_v15 = vld [vmem:[#allocation7 + $0x550] ss:$48 sps:$4 sm:$0xff]   ;;  %v5855_v18 = vld [vmem:[#allocation7 + $0x1fc] ss:$48 sps:$4 sm:$0xff]  }
  0x8a   :  { %2008 = vmatprep.subr.bf16.mxu1 %v5762_v17  ;;  %v5852_v17 = vld [vmem:[#allocation7 + $0x4f4] ss:$48 sps:$4 sm:$0xff]  }
  0x8c   :  { %2036 = vmatpush1.bf16.msra.mxu0 %v5763_v20  ;;  %v5853_v20 = vld [vmem:[#allocation7 + $0x1f8] ss:$48 sps:$4 sm:$0xff]  }
  0x8d   :  { %2009 = vmatpush2.bf16.msra.mxu1 %v5760_v19  ;;  %2037 = vmatprep.subr.bf16.mxu0 %v5771_v22  ;;  %v5850_v19 = vld [vmem:[#allocation7 + $0x4f0] ss:$48 sps:$4 sm:$0xff]   ;;  %v5861_v22 = vld [vmem:[#allocation7 + $0x19c] ss:$48 sps:$4 sm:$0xff]  }
  0x8e   :  { %2010 = vmatprep.subr.bf16.mxu1 %v5768_v21  ;;  %v5858_v21 = vld [vmem:[#allocation7 + $0x494] ss:$48 sps:$4 sm:$0xff]  }
  0x90   :  { %2038 = vmatpush1.bf16.msra.mxu0 %v5769_v24  ;;  %v5864_v24 = vld [vmem:[#allocation7 + $0x434] ss:$48 sps:$4 sm:$0xff]  }
  0x91   :  { %2011 = vmatpush2.bf16.msra.mxu1 %v5766_v23  ;;  %2039 = vmatprep.subr.bf16.mxu0 %v5777_v26  ;;  %v5856_v23 = vld [vmem:[#allocation7 + $0x490] ss:$48 sps:$4 sm:$0xff]  }
  0x92   :  { %2012 = vmatprep.subr.bf16.mxu1 %v5774_v25  ;;  %v5867_v25 = vld [vmem:[#allocation7 + $0x13c] ss:$48 sps:$4 sm:$0xff]   ;;  %v5862_v26 = vld [vmem:[#allocation7 + $0x430] ss:$48 sps:$4 sm:$0xff]  }
  0x94   :  { %2040 = vmatpush1.bf16.msra.mxu0 %v5775_v28  ;;  %v5873_v28 = vld [vmem:[#allocation7 + $0xdc] ss:$48 sps:$4 sm:$0xff]  }
  0x95   :  { %2013 = vmatpush2.bf16.msra.mxu1 %v5772_v27  ;;  %2041 = vmatprep.subr.bf16.mxu0 %v5783_v30  ;;  %v5870_v27 = vld [vmem:[#allocation7 + $0x3d4] ss:$48 sps:$4 sm:$0xff]   ;;  %v5871_v30 = vld [vmem:[#allocation7 + $0xd8] ss:$48 sps:$4 sm:$0xff]  }
  0x96   :  { %2014 = vmatprep.subr.bf16.mxu1 %v5780_v29  ;;  %v5868_v29 = vld [vmem:[#allocation7 + $0x3d0] ss:$48 sps:$4 sm:$0xff]  }
  0x98   :  { %2042 = vmatpush1.bf16.msra.mxu0 %v5781_v32  ;;  %v5879_v32 = vld [vmem:[#allocation7 + $0x7c] ss:$48 sps:$4 sm:$0xff]  }
  0x99   :  { %2015 = vmatpush2.bf16.msra.mxu1 %v5778_v31  ;;  %2043 = vmatprep.subr.bf16.mxu0 %v5789_v34  ;;  %v5876_v31 = vld [vmem:[#allocation7 + $0x374] ss:$48 sps:$4 sm:$0xff]   ;;  %v5877_v34 = vld [vmem:[#allocation7 + $0x78] ss:$48 sps:$4 sm:$0xff]  }
  0x9a   :  { %2016 = vmatprep.subr.bf16.mxu1 %v5786_v33  ;;  %v5874_v33 = vld [vmem:[#allocation7 + $0x370] ss:$48 sps:$4 sm:$0xff]  }
  0x9c   :  { %2044 = vmatpush1.bf16.msra.mxu0 %v5787_v37  ;;  %v5885_v37 = vld [vmem:[#allocation7 + $0x1c] ss:$48 sps:$4 sm:$0xff]  }
  0x9d   :  { %2017 = vmatpush2.bf16.msra.mxu1 %v5784_v36  ;;  %2072 = vmatprep.subr.bf16.mxu0 %v5792_v38  ;;  %v5882_v36 = vld [vmem:[#allocation7 + $0x314] ss:$48 sps:$4 sm:$0xff]   ;;  %v5880_v38 = vld [vmem:[#allocation7 + $0x310] ss:$48 sps:$4 sm:$0xff]  }
  0x9e   :  { %2115 = vmatprep.subr.bf16.mxu1 %v5795_v39  ;;  %v5883_v39 = vld [vmem:[#allocation7 + $0x18] ss:$48 sps:$4 sm:$0xff]  }
  0x9f   :  { %2062 = vmatmul.mubr.bf16.vlgmr.msra.gmra.mxu0 %v6658_v35 }
  0xa0   :  { %2019 = vmatmul.mubr.bf16.vlgmr.msra.gmra.mxu1 %v6665_v6  ;;  %2073 = vmatpush1.bf16.msra.mxu0 %v5790_v40  ;;  %v5888_v40 = vld [vmem:[#allocation7 + $0x5bc] ss:$48 sps:$4 sm:$0xff]  }
  0xa1   :  { %2116 = vmatpush1.bf16.msra.mxu1 %v5793_v41  ;;  %2074 = vmatprep.subr.bf16.mxu0 %v5798_v42  ;;  %v5891_v41 = vld [vmem:[#allocation7 + $0x8bc] ss:$48 sps:$4 sm:$0xff]   ;;  %v5886_v42 = vld [vmem:[#allocation7 + $0x5b8] ss:$48 sps:$4 sm:$0xff]  }
  0xa2   :  { %2117 = vmatprep.subr.bf16.mxu1 %v5801_v43  ;;  %2147 = vmatprep.mubr.bf16.mxu1 %v6603_v0  ;;  %v5889_v43 = vld [vmem:[#allocation7 + $0x8b8] ss:$48 sps:$4 sm:$0xff]  }
  0xa3   :  { %2104 = vmatprep.mubr.bf16.mxu0 %v6661_v51 }
  0xa4   :  { %2075 = vmatpush1.bf16.msra.mxu0 %v5796_v44  ;;  %v5894_v44 = vld [vmem:[#allocation7 + $0x55c] ss:$48 sps:$4 sm:$0xff]  }
  0xa5   :  { %2118 = vmatpush1.bf16.msra.mxu1 %v5799_v45  ;;  %2076 = vmatprep.subr.bf16.mxu0 %v5804_v46  ;;  %v5897_v45 = vld [vmem:[#allocation7 + $0x85c] ss:$48 sps:$4 sm:$0xff]   ;;  %v5892_v46 = vld [vmem:[#allocation7 + $0x558] ss:$48 sps:$4 sm:$0xff]  }
  0xa6   :  { %2119 = vmatprep.subr.bf16.mxu1 %v5807_v47  ;;  %v5895_v47 = vld [vmem:[#allocation7 + $0x858] ss:$48 sps:$4 sm:$0xff]  }
  0xa8   :  { %2077 = vmatpush1.bf16.msra.mxu0 %v5802_v48  ;;  %v5900_v48 = vld [vmem:[#allocation7 + $0x4fc] ss:$48 sps:$4 sm:$0xff]  }
  0xa9   :  { %2120 = vmatpush1.bf16.msra.mxu1 %v5805_v49  ;;  %2078 = vmatprep.subr.bf16.mxu0 %v5810_v50  ;;  %v5903_v49 = vld [vmem:[#allocation7 + $0x7fc] ss:$48 sps:$4 sm:$0xff]   ;;  %v5898_v50 = vld [vmem:[#allocation7 + $0x4f8] ss:$48 sps:$4 sm:$0xff]  }
  0xaa   :  { %2121 = vmatprep.subr.bf16.mxu1 %v5813_v52  ;;  %v5901_v52 = vld [vmem:[#allocation7 + $0x7f8] ss:$48 sps:$4 sm:$0xff]  }
  0xac   :  { %2079 = vmatpush1.bf16.msra.mxu0 %v5808_v53  ;;  %v5906_v53 = vld [vmem:[#allocation7 + $0x49c] ss:$48 sps:$4 sm:$0xff]  }
  0xad   :  { %2122 = vmatpush1.bf16.msra.mxu1 %v5811_v54  ;;  %2080 = vmatprep.subr.bf16.mxu0 %v5816_v55  ;;  %v5909_v54 = vld [vmem:[#allocation7 + $0x79c] ss:$48 sps:$4 sm:$0xff]   ;;  %v5904_v55 = vld [vmem:[#allocation7 + $0x498] ss:$48 sps:$4 sm:$0xff]  }
  0xae   :  { %2123 = vmatprep.subr.bf16.mxu1 %v5819_v56  ;;  %v5907_v56 = vld [vmem:[#allocation7 + $0x798] ss:$48 sps:$4 sm:$0xff]  }
  0xb0   :  { %2081 = vmatpush1.bf16.msra.mxu0 %v5814_v57  ;;  %v5912_v57 = vld [vmem:[#allocation7 + $0x43c] ss:$48 sps:$4 sm:$0xff]  }
  0xb1   :  { %2124 = vmatpush1.bf16.msra.mxu1 %v5817_v58  ;;  %2082 = vmatprep.subr.bf16.mxu0 %v5822_v59  ;;  %v5915_v58 = vld [vmem:[#allocation7 + $0x73c] ss:$48 sps:$4 sm:$0xff]   ;;  %v5910_v59 = vld [vmem:[#allocation7 + $0x438] ss:$48 sps:$4 sm:$0xff]  }
  0xb2   :  { %2125 = vmatprep.subr.bf16.mxu1 %v5825_v60  ;;  %v5913_v60 = vld [vmem:[#allocation7 + $0x738] ss:$48 sps:$4 sm:$0xff]  }
  0xb4   :  { %2083 = vmatpush1.bf16.msra.mxu0 %v5820_v61  ;;  %v5918_v61 = vld [vmem:[#allocation7 + $0x3dc] ss:$48 sps:$4 sm:$0xff]  }
  0xb5   :  { %2126 = vmatpush1.bf16.msra.mxu1 %v5823_v62  ;;  %2084 = vmatprep.subr.bf16.mxu0 %v5828_v63  ;;  %v5921_v62 = vld [vmem:[#allocation7 + $0x6dc] ss:$48 sps:$4 sm:$0xff]   ;;  %v5916_v63 = vld [vmem:[#allocation7 + $0x3d8] ss:$48 sps:$4 sm:$0xff]  }
  0xb6   :  { %2127 = vmatprep.subr.bf16.mxu1 %v5831_v1  ;;  %v5919_v1 = vld [vmem:[#allocation7 + $0x6d8] ss:$48 sps:$4 sm:$0xff]  }
  0xb8   :  { %2085 = vmatpush1.bf16.msra.mxu0 %v5826_v2  ;;  %v5924_v2 = vld [vmem:[#allocation7 + $0x37c] ss:$48 sps:$4 sm:$0xff]  }
  0xb9   :  { %2128 = vmatpush1.bf16.msra.mxu1 %v5829_v3  ;;  %2086 = vmatprep.subr.bf16.mxu0 %v5834_v4  ;;  %v5927_v3 = vld [vmem:[#allocation7 + $0x67c] ss:$48 sps:$4 sm:$0xff]   ;;  %v5922_v4 = vld [vmem:[#allocation7 + $0x378] ss:$48 sps:$4 sm:$0xff]  }
  0xba   :  { %2129 = vmatprep.subr.bf16.mxu1 %v5837_v5  ;;  %v5925_v5 = vld [vmem:[#allocation7 + $0x678] ss:$48 sps:$4 sm:$0xff]  }
  0xbc   :  { %2087 = vmatpush1.bf16.msra.mxu0 %v5832_v7  ;;  %v5930_v7 = vld [vmem:[#allocation7 + $0x31c] ss:$48 sps:$4 sm:$0xff]  }
  0xbd   :  { %2130 = vmatpush1.bf16.msra.mxu1 %v5835_v8  ;;  %2088 = vmatprep.subr.bf16.mxu0 %v5840_v9  ;;  %v5933_v8 = vld [vmem:[#allocation7 + $0x61c] ss:$48 sps:$4 sm:$0xff]   ;;  %v5928_v9 = vld [vmem:[#allocation7 + $0x318] ss:$48 sps:$4 sm:$0xff]  }
  0xbe   :  { %2158 = vmatprep.subr.bf16.mxu1 %v5843_v10  ;;  %v5931_v10 = vld [vmem:[#allocation7 + $0x618] ss:$48 sps:$4 sm:$0xff]  }
  0xc0   :  { %2148 = vmatmul.mubr.bf16.vlgmr.msra.gmra.mxu1 %v6658_v35  ;;  %2089 = vmatpush2.bf16.msra.mxu0 %v5838_v11  ;;  %v5859_v35 = vld [vmem:[#allocation7 + $0x198] ss:$48 sps:$4 sm:$0xff]   ;;  %v5936_v11 = vld [vmem:[#allocation7 + $0x2c4] ss:$48 sps:$4 sm:$0xff]  }
  0xc1   :  { %2159 = vmatpush1.bf16.msra.mxu1 %v5841_v12  ;;  %2090 = vmatprep.subr.bf16.mxu0 %v5846_v13  ;;  %v5939_v12 = vld [vmem:[#allocation7 + $0x8c4] ss:$48 sps:$4 sm:$0xff]   ;;  %v5934_v13 = vld [vmem:[#allocation7 + $0x2c0] ss:$48 sps:$4 sm:$0xff]  }
  0xc2   :  { %2160 = vmatprep.subr.bf16.mxu1 %v5849_v14  ;;  %2190 = vmatprep.mubr.bf16.mxu1 %v6661_v51  ;;  %v5865_v51 = vld [vmem:[#allocation7 + $0x138] ss:$48 sps:$4 sm:$0xff]   ;;  %v5937_v14 = vld [vmem:[#allocation7 + $0x8c0] ss:$48 sps:$4 sm:$0xff]  }
  0xc4   :  { %2091 = vmatpush2.bf16.msra.mxu0 %v5844_v15  ;;  %v5942_v15 = vld [vmem:[#allocation7 + $0x264] ss:$48 sps:$4 sm:$0xff]  }
  0xc5   :  { %2161 = vmatpush1.bf16.msra.mxu1 %v5847_v16  ;;  %2092 = vmatprep.subr.bf16.mxu0 %v5852_v17  ;;  %v5945_v16 = vld [vmem:[#allocation7 + $0x864] ss:$48 sps:$4 sm:$0xff]   ;;  %v6678_v17 = vld [vmem:[#allocation4 + $0x8] ss:$12 sps:$4 sm:$0xff]  }
  0xc6   :  { %2162 = vmatprep.subr.bf16.mxu1 %v5855_v18  ;;  %v5940_v18 = vld [vmem:[#allocation7 + $0x260] ss:$48 sps:$4 sm:$0xff]  }
  0xc8   :  { %2093 = vmatpush2.bf16.msra.mxu0 %v5850_v19  ;;  %v5943_v19 = vld [vmem:[#allocation7 + $0x860] ss:$48 sps:$4 sm:$0xff]  }
  0xc9   :  { %2163 = vmatpush1.bf16.msra.mxu1 %v5853_v20  ;;  %2094 = vmatprep.subr.bf16.mxu0 %v5858_v21  ;;  %v5948_v20 = vld [vmem:[#allocation7 + $0x204] ss:$48 sps:$4 sm:$0xff]  }
  0xca   :  { %2164 = vmatprep.subr.bf16.mxu1 %v5861_v22  ;;  %v5951_v21 = vld [vmem:[#allocation7 + $0x804] ss:$48 sps:$4 sm:$0xff]   ;;  %v6682_v22 = vld [vmem:[#allocation4 + $0x4] ss:$12 sps:$4 sm:$0xff]  }
  0xcc   :  { %2095 = vmatpush2.bf16.msra.mxu0 %v5856_v23  ;;  %v5946_v23 = vld [vmem:[#allocation7 + $0x200] ss:$48 sps:$4 sm:$0xff]  }
  0xcd   :  { %2165 = vmatpush1.bf16.msra.mxu1 %v5859_v35  ;;  %2096 = vmatprep.subr.bf16.mxu0 %v5864_v24  ;;  %v5954_v35 = vld [vmem:[#allocation7 + $0x1a4] ss:$48 sps:$4 sm:$0xff]  }
  0xce   :  { %2166 = vmatprep.subr.bf16.mxu1 %v5867_v25  ;;  %v5957_v24 = vld [vmem:[#allocation7 + $0x7a4] ss:$48 sps:$4 sm:$0xff]   ;;  %v5952_v25 = vld [vmem:[#allocation7 + $0x1a0] ss:$48 sps:$4 sm:$0xff]  }
  0xd0   :  { %2097 = vmatpush2.bf16.msra.mxu0 %v5862_v26  ;;  %v5955_v26 = vld [vmem:[#allocation7 + $0x7a0] ss:$48 sps:$4 sm:$0xff]  }
  0xd1   :  { %2167 = vmatpush1.bf16.msra.mxu1 %v5865_v51  ;;  %2098 = vmatprep.subr.bf16.mxu0 %v5870_v27  ;;  %v5960_v51 = vld [vmem:[#allocation7 + $0x144] ss:$48 sps:$4 sm:$0xff]  }
  0xd2   :  { %2168 = vmatprep.subr.bf16.mxu1 %v5873_v28  ;;  %v5963_v27 = vld [vmem:[#allocation7 + $0x744] ss:$48 sps:$4 sm:$0xff]   ;;  %v5958_v28 = vld [vmem:[#allocation7 + $0x140] ss:$48 sps:$4 sm:$0xff]  }
  0xd4   :  { %2099 = vmatpush2.bf16.msra.mxu0 %v5868_v29  ;;  %v5961_v29 = vld [vmem:[#allocation7 + $0x740] ss:$48 sps:$4 sm:$0xff]  }
  0xd5   :  { %2169 = vmatpush1.bf16.msra.mxu1 %v5871_v30  ;;  %2100 = vmatprep.subr.bf16.mxu0 %v5876_v31  ;;  %v5966_v30 = vld [vmem:[#allocation7 + $0xe4] ss:$48 sps:$4 sm:$0xff]  }
  0xd6   :  { %2170 = vmatprep.subr.bf16.mxu1 %v5879_v32  ;;  %v5969_v31 = vld [vmem:[#allocation7 + $0x6e4] ss:$48 sps:$4 sm:$0xff]   ;;  %v5964_v32 = vld [vmem:[#allocation7 + $0xe0] ss:$48 sps:$4 sm:$0xff]  }
  0xd8   :  { %2101 = vmatpush2.bf16.msra.mxu0 %v5874_v33  ;;  %v5967_v33 = vld [vmem:[#allocation7 + $0x6e0] ss:$48 sps:$4 sm:$0xff]  }
  0xd9   :  { %2171 = vmatpush1.bf16.msra.mxu1 %v5877_v34  ;;  %2102 = vmatprep.subr.bf16.mxu0 %v5882_v36  ;;  %v5972_v34 = vld [vmem:[#allocation7 + $0x84] ss:$48 sps:$4 sm:$0xff]  }
  0xda   :  { %2172 = vmatprep.subr.bf16.mxu1 %v5885_v37  ;;  %v5975_v36 = vld [vmem:[#allocation7 + $0x684] ss:$48 sps:$4 sm:$0xff]   ;;  %v5970_v37 = vld [vmem:[#allocation7 + $0x80] ss:$48 sps:$4 sm:$0xff]  }
  0xdc   :  { %2103 = vmatpush2.bf16.msra.mxu0 %v5880_v38  ;;  %v5973_v38 = vld [vmem:[#allocation7 + $0x680] ss:$48 sps:$4 sm:$0xff]  }
  0xdd   :  { %2173 = vmatpush1.bf16.msra.mxu1 %v5883_v39  ;;  %2201 = vmatprep.subr.bf16.mxu0 %v5891_v41  ;;  %v5978_v39 = vld [vmem:[#allocation7 + $0x24] ss:$48 sps:$4 sm:$0xff]   ;;  %v5976_v41 = vld [vmem:[#allocation7 + $0x20] ss:$48 sps:$4 sm:$0xff]  }
  0xde   :  { %2174 = vmatprep.subr.bf16.mxu1 %v5888_v40  ;;  %v5981_v40 = vld [vmem:[#allocation7 + $0x624] ss:$48 sps:$4 sm:$0xff]  }
  0xdf   :  { %2105 = vmatmul.mubr.bf16.vlgmr.msra.gmra.mxu0 %v6665_v6 }
  0xe0   :  { %2202 = vmatpush1.bf16.msra.mxu0 %v5889_v43  ;;  %2233 = vmatprep.mubr.bf16.mxu0 %v6603_v0  ;;  %v5984_v43 = vld [vmem:[#allocation7 + $0x5c4] ss:$48 sps:$4 sm:$0xff]  }
  0xe1   :  { %2175 = vmatpush2.bf16.msra.mxu1 %v5886_v42  ;;  %2203 = vmatprep.subr.bf16.mxu0 %v5897_v45  ;;  %v5979_v42 = vld [vmem:[#allocation7 + $0x620] ss:$48 sps:$4 sm:$0xff]  }
  0xe2   :  { %2176 = vmatprep.subr.bf16.mxu1 %v5894_v44  ;;  %v5987_v44 = vld [vmem:[#allocation7 + $0x2cc] ss:$48 sps:$4 sm:$0xff]   ;;  %v5982_v45 = vld [vmem:[#allocation7 + $0x5c0] ss:$48 sps:$4 sm:$0xff]  }
  0xe4   :  { %2204 = vmatpush1.bf16.msra.mxu0 %v5895_v47  ;;  %v5990_v47 = vld [vmem:[#allocation7 + $0x564] ss:$48 sps:$4 sm:$0xff]  }
  0xe5   :  { %2177 = vmatpush2.bf16.msra.mxu1 %v5892_v46  ;;  %2205 = vmatprep.subr.bf16.mxu0 %v5903_v49  ;;  %v5985_v46 = vld [vmem:[#allocation7 + $0x2c8] ss:$48 sps:$4 sm:$0xff]   ;;  %v5988_v49 = vld [vmem:[#allocation7 + $0x560] ss:$48 sps:$4 sm:$0xff]  }
  0xe6   :  { %2178 = vmatprep.subr.bf16.mxu1 %v5900_v48  ;;  %v5993_v48 = vld [vmem:[#allocation7 + $0x26c] ss:$48 sps:$4 sm:$0xff]  }
  0xe8   :  { %2206 = vmatpush1.bf16.msra.mxu0 %v5901_v52  ;;  %v5996_v52 = vld [vmem:[#allocation7 + $0x504] ss:$48 sps:$4 sm:$0xff]  }
  0xe9   :  { %2179 = vmatpush2.bf16.msra.mxu1 %v5898_v50  ;;  %2207 = vmatprep.subr.bf16.mxu0 %v5909_v54  ;;  %v5991_v50 = vld [vmem:[#allocation7 + $0x268] ss:$48 sps:$4 sm:$0xff]   ;;  %v5994_v54 = vld [vmem:[#allocation7 + $0x500] ss:$48 sps:$4 sm:$0xff]  }
  0xea   :  { %2180 = vmatprep.subr.bf16.mxu1 %v5906_v53  ;;  %v5999_v53 = vld [vmem:[#allocation7 + $0x20c] ss:$48 sps:$4 sm:$0xff]  }
  0xec   :  { %2208 = vmatpush1.bf16.msra.mxu0 %v5907_v56  ;;  %v6002_v56 = vld [vmem:[#allocation7 + $0x4a4] ss:$48 sps:$4 sm:$0xff]  }
  0xed   :  { %2181 = vmatpush2.bf16.msra.mxu1 %v5904_v55  ;;  %2209 = vmatprep.subr.bf16.mxu0 %v5915_v58  ;;  %v5997_v55 = vld [vmem:[#allocation7 + $0x208] ss:$48 sps:$4 sm:$0xff]   ;;  %v6000_v58 = vld [vmem:[#allocation7 + $0x4a0] ss:$48 sps:$4 sm:$0xff]  }
  0xee   :  { %2182 = vmatprep.subr.bf16.mxu1 %v5912_v57  ;;  %v6005_v57 = vld [vmem:[#allocation7 + $0x1ac] ss:$48 sps:$4 sm:$0xff]  }
  0xf0   :  { %2210 = vmatpush1.bf16.msra.mxu0 %v5913_v60  ;;  %v6008_v60 = vld [vmem:[#allocation7 + $0x444] ss:$48 sps:$4 sm:$0xff]  }
  0xf1   :  { %2183 = vmatpush2.bf16.msra.mxu1 %v5910_v59  ;;  %2211 = vmatprep.subr.bf16.mxu0 %v5921_v62  ;;  %v6003_v59 = vld [vmem:[#allocation7 + $0x1a8] ss:$48 sps:$4 sm:$0xff]   ;;  %v6006_v62 = vld [vmem:[#allocation7 + $0x440] ss:$48 sps:$4 sm:$0xff]  }
  0xf2   :  { %2184 = vmatprep.subr.bf16.mxu1 %v5918_v61  ;;  %v6011_v61 = vld [vmem:[#allocation7 + $0x14c] ss:$48 sps:$4 sm:$0xff]  }
  0xf4   :  { %2212 = vmatpush1.bf16.msra.mxu0 %v5919_v1  ;;  %v6014_v1 = vld [vmem:[#allocation7 + $0x3e4] ss:$48 sps:$4 sm:$0xff]  }
  0xf5   :  { %2185 = vmatpush2.bf16.msra.mxu1 %v5916_v63  ;;  %2213 = vmatprep.subr.bf16.mxu0 %v5927_v3  ;;  %v6009_v63 = vld [vmem:[#allocation7 + $0x148] ss:$48 sps:$4 sm:$0xff]   ;;  %v6012_v3 = vld [vmem:[#allocation7 + $0x3e0] ss:$48 sps:$4 sm:$0xff]  }
  0xf6   :  { %2186 = vmatprep.subr.bf16.mxu1 %v5924_v2  ;;  %v6017_v2 = vld [vmem:[#allocation7 + $0xec] ss:$48 sps:$4 sm:$0xff]  }
  0xf8   :  { %2214 = vmatpush1.bf16.msra.mxu0 %v5925_v5  ;;  %v6020_v5 = vld [vmem:[#allocation7 + $0x384] ss:$48 sps:$4 sm:$0xff]  }
  0xf9   :  { %2187 = vmatpush2.bf16.msra.mxu1 %v5922_v4  ;;  %2215 = vmatprep.subr.bf16.mxu0 %v5933_v8  ;;  %v6015_v4 = vld [vmem:[#allocation7 + $0xe8] ss:$48 sps:$4 sm:$0xff]   ;;  %v6023_v8 = vld [vmem:[#allocation7 + $0x8c] ss:$48 sps:$4 sm:$0xff]  }
  0xfa   :  { %2188 = vmatprep.subr.bf16.mxu1 %v5930_v7  ;;  %v384_v7 = vlaneseq }
  0xfc   :  { %2216 = vmatpush1.bf16.msra.mxu0 %v5931_v10  ;;  %v6021_v10 = vld [vmem:[#allocation7 + $0x88] ss:$48 sps:$4 sm:$0xff]  }
  0xfd   :  { %2189 = vmatpush2.bf16.msra.mxu1 %v5928_v9  ;;  %2244 = vmatprep.subr.bf16.mxu0 %v5936_v11  ;;  %v6018_v9 = vld [vmem:[#allocation7 + $0x380] ss:$48 sps:$4 sm:$0xff]   ;;  %v6026_v11 = vld [vmem:[#allocation7 + $0x324] ss:$48 sps:$4 sm:$0xff]  }
  0xfe   :  { %2287 = vmatprep.subr.bf16.mxu1 %v5939_v12  ;;  %v6687_v12 = vshrl.u32 %v384_v7, 7  ;;  %v6072_v7 = vld [vmem:[#allocation7 + $0x328] ss:$48 sps:$4 sm:$0xff]  }
  0xff   :  { %2234 = vmatmul.mubr.bf16.vlgmr.msra.gmra.mxu0 %v6678_v17 }
 0x100   :  { %2191 = vmatmul.mubr.bf16.vlgmr.msra.gmra.mxu1 %v6665_v6  ;;  %2245 = vmatpush1.bf16.msra.mxu0 %v5934_v13  ;;  %v5949_v6 = vld [vmem:[#allocation7 + $0x800] ss:$48 sps:$4 sm:$0xff]   ;;  %v6029_v13 = vld [vmem:[#allocation7 + $0x2c] ss:$48 sps:$4 sm:$0xff]  }
 0x101   :  { %2288 = vmatpush1.bf16.msra.mxu1 %v5937_v14  ;;  %2246 = vmatprep.subr.bf16.mxu0 %v5942_v15  ;;  %v6024_v14 = vld [vmem:[#allocation7 + $0x320] ss:$48 sps:$4 sm:$0xff]   ;;  %v6027_v15 = vld [vmem:[#allocation7 + $0x28] ss:$48 sps:$4 sm:$0xff]  }
 0x102   :  { %2289 = vmatprep.subr.bf16.mxu1 %v5945_v16  ;;  %2319 = vmatprep.mubr.bf16.mxu1 %v6603_v0  ;;  %v6689_v16 = vld [vmem:[#allocation9] sm:$0xff] }
 0x103   :  { %2276 = vmatprep.mubr.bf16.mxu0 %v6682_v22 }
 0x104   :  { %2247 = vmatpush1.bf16.msra.mxu0 %v5940_v18  ;;  %v6692_v18 = vsub.s32 0, %v6687_v12 }
 0x105   :  { %2290 = vmatpush1.bf16.msra.mxu1 %v5943_v19  ;;  %2248 = vmatprep.subr.bf16.mxu0 %v5948_v20  ;;  %v6032_v19 = vld [vmem:[#allocation7 + $0x5cc] ss:$48 sps:$4 sm:$0xff]  }
 0x106   :  { %2291 = vmatprep.subr.bf16.mxu1 %v5951_v21  ;;  %v6035_v20 = vld [vmem:[#allocation7 + $0x8cc] ss:$48 sps:$4 sm:$0xff]   ;;  %v6030_v21 = vld [vmem:[#allocation7 + $0x5c8] ss:$48 sps:$4 sm:$0xff]  }
 0x108   :  { %2249 = vmatpush1.bf16.msra.mxu0 %v5946_v23  ;;  %v387_v23 = vrot.slane %v6689_v16, %v6692_v18 }
 0x109   :  { %2292 = vmatpush1.bf16.msra.mxu1 %v5949_v6  ;;  %2250 = vmatprep.subr.bf16.mxu0 %v5954_v35  ;;  %v6038_v6 = vld [vmem:[#allocation7 + $0x56c] ss:$48 sps:$4 sm:$0xff]  }
 0x10a   :  { %2293 = vmatprep.subr.bf16.mxu1 %v5957_v24  ;;  %v6041_v24 = vld [vmem:[#allocation7 + $0x86c] ss:$48 sps:$4 sm:$0xff]  }
 0x10c   :  { %2251 = vmatpush1.bf16.msra.mxu0 %v5952_v25 }
 0x10d   :  { %2294 = vmatpush1.bf16.msra.mxu1 %v5955_v26  ;;  %2252 = vmatprep.subr.bf16.mxu0 %v5960_v51  ;;  %v6696_v26 = vld [vmem:[#allocation4] ss:$12 sps:$4 sm:$0xff]  }
 0x10e   :  { %2295 = vmatprep.subr.bf16.mxu1 %v5963_v27  ;;  %v6036_v51 = vld [vmem:[#allocation7 + $0x568] ss:$48 sps:$4 sm:$0xff]  }
 0x10f   :  { %v6039_v27 = vld [vmem:[#allocation7 + $0x868] ss:$48 sps:$4 sm:$0xff]  }
 0x110   :  { %2253 = vmatpush1.bf16.msra.mxu0 %v5958_v28 }
 0x111   :  { %2296 = vmatpush1.bf16.msra.mxu1 %v5961_v29  ;;  %2254 = vmatprep.subr.bf16.mxu0 %v5966_v30  ;;  %v6044_v29 = vld [vmem:[#allocation7 + $0x50c] ss:$48 sps:$4 sm:$0xff]  }
 0x112   :  { %2297 = vmatprep.subr.bf16.mxu1 %v5969_v31 }
 0x114   :  { %2255 = vmatpush1.bf16.msra.mxu0 %v5964_v32  ;;  %v6047_v32 = vld [vmem:[#allocation7 + $0x80c] ss:$48 sps:$4 sm:$0xff]  }
 0x115   :  { %2298 = vmatpush1.bf16.msra.mxu1 %v5967_v33  ;;  %2256 = vmatprep.subr.bf16.mxu0 %v5972_v34  ;;  %v6042_v34 = vld [vmem:[#allocation7 + $0x508] ss:$48 sps:$4 sm:$0xff]  }
 0x116   :  { %2299 = vmatprep.subr.bf16.mxu1 %v5975_v36 }
 0x118   :  { %2257 = vmatpush1.bf16.msra.mxu0 %v5970_v37  ;;  %v6045_v37 = vld [vmem:[#allocation7 + $0x808] ss:$48 sps:$4 sm:$0xff]  }
 0x119   :  { %2300 = vmatpush1.bf16.msra.mxu1 %v5973_v38  ;;  %2258 = vmatprep.subr.bf16.mxu0 %v5978_v39  ;;  %v6050_v38 = vld [vmem:[#allocation7 + $0x4ac] ss:$48 sps:$4 sm:$0xff]  }
 0x11a   :  { %2301 = vmatprep.subr.bf16.mxu1 %v5981_v40  ;;  %v6053_v39 = vld [vmem:[#allocation7 + $0x7ac] ss:$48 sps:$4 sm:$0xff]  }
 0x11c   :  { %2259 = vmatpush1.bf16.msra.mxu0 %v5976_v41 }
 0x11d   :  { %2302 = vmatpush1.bf16.msra.mxu1 %v5979_v42  ;;  %2260 = vmatprep.subr.bf16.mxu0 %v5984_v43  ;;  %v6048_v43 = vld [vmem:[#allocation7 + $0x4a8] ss:$48 sps:$4 sm:$0xff]  }
 0x11e   :  { %2330 = vmatprep.subr.bf16.mxu1 %v5987_v44  ;;  %v6051_v44 = vld [vmem:[#allocation7 + $0x7a8] ss:$48 sps:$4 sm:$0xff]  }
 0x120   :  { %2320 = vmatmul.mubr.bf16.vlgmr.msra.gmra.mxu1 %v6678_v17  ;;  %2261 = vmatpush2.bf16.msra.mxu0 %v5982_v45  ;;  %v1977_v35 = vpop.f32.mrf.mxu1  ;;  %v6056_v45 = vld [vmem:[#allocation7 + $0x44c] ss:$48 sps:$4 sm:$0xff]  }
 0x121   :  { %2331 = vmatpush1.bf16.msra.mxu1 %v5985_v46  ;;  %2262 = vmatprep.subr.bf16.mxu0 %v5990_v47  ;;  %v6059_v46 = vld [vmem:[#allocation7 + $0x74c] ss:$48 sps:$4 sm:$0xff]  }
 0x122   :  { %2332 = vmatprep.subr.bf16.mxu1 %v5993_v48  ;;  %2362 = vmatprep.mubr.bf16.mxu1 %v6682_v22  ;;  %v6033_v22 = vld [vmem:[#allocation7 + $0x8c8] ss:$48 sps:$4 sm:$0xff]   ;;  %v6699_v30 = vpop.f32.mrf.mxu1 }
 0x124   :  { %2263 = vmatpush2.bf16.msra.mxu0 %v5988_v49  ;;  %v1981_v41 = vpop.f32.mrf.mxu1  ;;  %v6054_v49 = vld [vmem:[#allocation7 + $0x448] ss:$48 sps:$4 sm:$0xff]  }
 0x125   :  { %2333 = vmatpush1.bf16.msra.mxu1 %v5991_v50  ;;  %2264 = vmatprep.subr.bf16.mxu0 %v5996_v52  ;;  %v6057_v50 = vld [vmem:[#allocation7 + $0x748] ss:$48 sps:$4 sm:$0xff]   ;;  %v6062_v52 = vld [vmem:[#allocation7 + $0x3ec] ss:$48 sps:$4 sm:$0xff]  }
 0x126   :  { %2334 = vmatprep.subr.bf16.mxu1 %v5999_v53  ;;  %v6065_v53 = vld [vmem:[#allocation7 + $0x6ec] ss:$48 sps:$4 sm:$0xff]  }
 0x128   :  { %2265 = vmatpush2.bf16.msra.mxu0 %v5994_v54  ;;  %v6705_v54 = vsub.s32 1, %v6687_v12 }
 0x129   :  { %2335 = vmatpush1.bf16.msra.mxu1 %v5997_v55  ;;  %2266 = vmatprep.subr.bf16.mxu0 %v6002_v56  ;;  %v6060_v55 = vld [vmem:[#allocation7 + $0x3e8] ss:$48 sps:$4 sm:$0xff]  }
 0x12a   :  { %2336 = vmatprep.subr.bf16.mxu1 %v6005_v57  ;;  %v6063_v57 = vld [vmem:[#allocation7 + $0x6e8] ss:$48 sps:$4 sm:$0xff]  }
 0x12c   :  { %2267 = vmatpush2.bf16.msra.mxu0 %v6000_v58  ;;  %v391_v58 = vrot.slane %v6689_v16, %v6705_v54 }
 0x12d   :  { %2337 = vmatpush1.bf16.msra.mxu1 %v6003_v59  ;;  %2268 = vmatprep.subr.bf16.mxu0 %v6008_v60  ;;  %v6068_v59 = vld [vmem:[#allocation7 + $0x38c] ss:$48 sps:$4 sm:$0xff]  }
 0x12e   :  { %2338 = vmatprep.subr.bf16.mxu1 %v6011_v61  ;;  %v6071_v60 = vld [vmem:[#allocation7 + $0x68c] ss:$48 sps:$4 sm:$0xff]  }
 0x130   :  { %2269 = vmatpush2.bf16.msra.mxu0 %v6006_v62  ;;  %v6066_v62 = vld [vmem:[#allocation7 + $0x388] ss:$48 sps:$4 sm:$0xff]  }
 0x131   :  { %2339 = vmatpush1.bf16.msra.mxu1 %v6009_v63  ;;  %2270 = vmatprep.subr.bf16.mxu0 %v6014_v1  ;;  %v6069_v63 = vld [vmem:[#allocation7 + $0x688] ss:$48 sps:$4 sm:$0xff]  }
 0x132   :  { %2340 = vmatprep.subr.bf16.mxu1 %v6017_v2  ;;  %v1983_v2 = vpop.f32.mrf.mxu1 }
 0x134   :  { %2271 = vmatpush2.bf16.msra.mxu0 %v6012_v3  ;;  %v6074_v3 = vld [vmem:[#allocation7 + $0x32c] ss:$48 sps:$4 sm:$0xff]  }
 0x135   :  { %2341 = vmatpush1.bf16.msra.mxu1 %v6015_v4  ;;  %2272 = vmatprep.subr.bf16.mxu0 %v6020_v5  ;;  %v6077_v4 = vld [vmem:[#allocation7 + $0x62c] ss:$48 sps:$4 sm:$0xff]  }
 0x136   :  { %2342 = vmatprep.subr.bf16.mxu1 %v6023_v8  ;;  %v6075_v8 = vld [vmem:[#allocation7 + $0x628] ss:$48 sps:$4 sm:$0xff]  }
 0x138   :  { %2273 = vmatpush2.bf16.msra.mxu0 %v6018_v9 }
 0x139   :  { %2343 = vmatpush1.bf16.msra.mxu1 %v6021_v10  ;;  %2274 = vmatprep.subr.bf16.mxu0 %v6026_v11  ;;  %v6080_v10 = vld [vmem:[#allocation10 + $0xac] ss:$12 sps:$4 sm:$0xff]  }
 0x13a   :  { %2344 = vmatprep.subr.bf16.mxu1 %v6029_v13  ;;  %v6083_v11 = vld [vmem:[#allocation10 + $0x22c] ss:$12 sps:$4 sm:$0xff]  }
 0x13c   :  { %2275 = vmatpush2.bf16.msra.mxu0 %v6024_v14  ;;  %v6078_v14 = vld [vmem:[#allocation10 + $0xa8] ss:$12 sps:$4 sm:$0xff]  }
 0x13d   :  { %2345 = vmatpush1.bf16.msra.mxu1 %v6027_v15  ;;  %2373 = vmatprep.subr.bf16.mxu0 %v6035_v20  ;;  %v398_v15 = vsub.s32 3, %v6687_v12  ;;  %v6086_v20 = vld [vmem:[#allocation10 + $0x94] ss:$12 sps:$4 sm:$0xff]  }
 0x13e   :  { %2346 = vmatprep.subr.bf16.mxu1 %v6032_v19  ;;  %v6081_v19 = vld [vmem:[#allocation10 + $0x228] ss:$12 sps:$4 sm:$0xff]  }
 0x13f   :  { %v1934_v25 = vpop.f32.mrf.mxu0  ;;  %2277 = vmatmul.mubr.bf16.vlgmr.msra.gmra.mxu0 %v6696_v26 }
 0x140   :  { %v1935_v28 = vadd.f32 %v1934_v25, %v387_v23  ;;  %2374 = vmatpush1.bf16.msra.mxu0 %v6033_v22  ;;  %2405 = vmatprep.mubr.bf16.mxu0 %v6603_v0 }
 0x141   :  { %2347 = vmatpush2.bf16.msra.mxu1 %v6030_v21  ;;  %v1936_v31 = vpop.f32.mrf.mxu0  ;;  %2375 = vmatprep.subr.bf16.mxu0 %v6041_v24 }
 0x142   :  { %2348 = vmatprep.subr.bf16.mxu1 %v6038_v6  ;;  %v1978_v33 = vadd.f32 %v1977_v35, %v1935_v28  ;;  %v1937_v1 = vadd.f32 %v1936_v31, %v391_v58  ;;  %v6084_v6 = vld [vmem:[#allocation10 + $0x90] ss:$12 sps:$4 sm:$0xff]   ;;  %v6089_v35 = vld [vmem:[#allocation10 + $0x214] ss:$12 sps:$4 sm:$0xff]   ;;  %v6090_v31 = vld [vmem:[#allocation10 + $0x78] ss:$12 sps:$4 sm:$0xff]  }
 0x143   :  { %v1938_v36 = vpop.f32.mrf.mxu0 }
 0x144   :  { %v1939_v40 = vadd.f32 %v1938_v36, %v387_v23  ;;  %2376 = vmatpush1.bf16.msra.mxu0 %v6039_v27  ;;  %v2416_v47 = vmax.f32 %v1978_v33, 0.0  ;;  %v1980_v9 = vadd.f32 %v6699_v30, %v1937_v1  ;;  %v399_v23 = vrot.slane %v6689_v16, %v398_v15  ;;  %v6092_v27 = vld [vmem:[#allocation10 + $0x7c] ss:$12 sps:$4 sm:$0xff]   ;;  %v6123_v1 = vld [vmem:[#allocation10 + $0x180] ss:$12 sps:$4 sm:$0xff]  }
 0x145   :  { %2349 = vmatpush2.bf16.msra.mxu1 %v6036_v51  ;;  %2377 = vmatprep.subr.bf16.mxu0 %v6047_v32  ;;  %v1940_v56 = vpop.f32.mrf.mxu0  ;;  %v6087_v51 = vld [vmem:[#allocation10 + $0x210] ss:$12 sps:$4 sm:$0xff]  }
 0x146   :  { %2350 = vmatprep.subr.bf16.mxu1 %v6044_v29  ;;  %v1982_v42 = vadd.f32 %v1981_v41, %v1939_v40  ;;  %v1941_v61 = vadd.f32 %v1940_v56, %v391_v58  ;;  %v2417_v21 = vmax.f32 %v1980_v9, 0.0  ;;  %v6095_v32 = vld [vmem:[#allocation10 + $0x1fc] ss:$12 sps:$4 sm:$0xff]   ;;  %v6096_v40 = vld [vmem:[#allocation10 + $0x60] ss:$12 sps:$4 sm:$0xff]  }
 0x147   :  { %v6111_v56 = vld [vmem:[#allocation10 + $0x1b0] ss:$12 sps:$4 sm:$0xff]   ;;  %v6137_v9 = vld [vmem:[#allocation10 + $0x2d4] ss:$12 sps:$4 sm:$0xff]  }
 0x148   :  { %v2428_v48 = vmax.f32 %v1982_v42, 0.0  ;;  %2378 = vmatpush1.bf16.msra.mxu0 %v6045_v37  ;;  %v1984_v5 = vadd.f32 %v1983_v2, %v1941_v61  ;;  %v6098_v37 = vld [vmem:[#allocation10 + $0x64] ss:$12 sps:$4 sm:$0xff]   ;;  %v6099_v42 = vld [vmem:[#allocation10 + $0x1e0] ss:$12 sps:$4 sm:$0xff]  }
 0x149   :  { %2351 = vmatpush2.bf16.msra.mxu1 %v6042_v34  ;;  %2379 = vmatprep.subr.bf16.mxu0 %v6053_v39  ;;  %v6119_v58 = vld [vmem:[#allocation10 + $0x19c] ss:$12 sps:$4 sm:$0xff]   ;;  %v6122_v61 = vld [vmem:[#allocation10 + $0x4] ss:$12 sps:$4 sm:$0xff]   ;;  %v6128_v2 = vld [vmem:[#allocation10 + $0x16c] ss:$12 sps:$4 sm:$0xff]  }
 0x14a   :  { %2352 = vmatprep.subr.bf16.mxu1 %v6050_v38  ;;  %v6702_v0 = vpack.c.bf16 %v2428_v48, %v2416_v47  ;;  %v2429_v13 = vmax.f32 %v1984_v5, 0.0  ;;  %v6101_v38 = vld [vmem:[#allocation10 + $0x1e4] ss:$12 sps:$4 sm:$0xff]   ;;  %v6129_v5 = vld [vmem:[#allocation10 + $0x2e8] ss:$12 sps:$4 sm:$0xff]  }
 0x14c   :  { %2380 = vmatpush1.bf16.msra.mxu0 %v6051_v44  ;;  %v6711_v22 = vpack.c.bf16 %v2429_v13, %v2417_v21  ;;  %v6104_v44 = vld [vmem:[#allocation10 + $0x4c] ss:$12 sps:$4 sm:$0xff]  }
 0x14d   :  { %2353 = vmatpush2.bf16.msra.mxu1 %v6048_v43  ;;  %2381 = vmatprep.subr.bf16.mxu0 %v6059_v46  ;;  %v6138_v13 = vld [vmem:[#allocation10 + $0x138] ss:$12 sps:$4 sm:$0xff]   ;;  %v6144_v21 = vld [vmem:[#allocation10 + $0x120] ss:$12 sps:$4 sm:$0xff]  }
 0x14e   :  { %2354 = vmatprep.subr.bf16.mxu1 %v6056_v45  ;;  %v6107_v45 = vld [vmem:[#allocation10 + $0x1cc] ss:$12 sps:$4 sm:$0xff]  }
 0x150   :  { %2382 = vmatpush1.bf16.msra.mxu0 %v6057_v50  ;;  %v6105_v50 = vld [vmem:[#allocation10 + $0x1c8] ss:$12 sps:$4 sm:$0xff]  }
 0x151   :  { %2355 = vmatpush2.bf16.msra.mxu1 %v6054_v49  ;;  %2383 = vmatprep.subr.bf16.mxu0 %v6065_v53  ;;  %v6102_v49 = vld [vmem:[#allocation10 + $0x48] ss:$12 sps:$4 sm:$0xff]  }
 0x152   :  { %2356 = vmatprep.subr.bf16.mxu1 %v6062_v52  ;;  %v6110_v52 = vld [vmem:[#allocation10 + $0x34] ss:$12 sps:$4 sm:$0xff]  }
 0x153   :  { %v6113_v53 = vld [vmem:[#allocation10 + $0x1b4] ss:$12 sps:$4 sm:$0xff]  }
 0x154   :  { %2384 = vmatpush1.bf16.msra.mxu0 %v6063_v57  ;;  %v6116_v57 = vld [vmem:[#allocation10 + $0x1c] ss:$12 sps:$4 sm:$0xff]  }
 0x155   :  { %2357 = vmatpush2.bf16.msra.mxu1 %v6060_v55  ;;  %2385 = vmatprep.subr.bf16.mxu0 %v6071_v60  ;;  %v6108_v55 = vld [vmem:[#allocation10 + $0x30] ss:$12 sps:$4 sm:$0xff]   ;;  %v6117_v60 = vld [vmem:[#allocation10 + $0x198] ss:$12 sps:$4 sm:$0xff]  }
 0x156   :  { %2358 = vmatprep.subr.bf16.mxu1 %v6068_v59  ;;  %v6114_v59 = vld [vmem:[#allocation10 + $0x18] ss:$12 sps:$4 sm:$0xff]  }
 0x158   :  { %2386 = vmatpush1.bf16.msra.mxu0 %v6069_v63  ;;  %v6120_v63 = vld [vmem:[#allocation10] ss:$12 sps:$4 sm:$0xff]  }
 0x159   :  { %2359 = vmatpush2.bf16.msra.mxu1 %v6066_v62  ;;  %2387 = vmatprep.subr.bf16.mxu0 %v6077_v4  ;;  %v6125_v62 = vld [vmem:[#allocation10 + $0x184] ss:$12 sps:$4 sm:$0xff]   ;;  %v6126_v4 = vld [vmem:[#allocation10 + $0x168] ss:$12 sps:$4 sm:$0xff]  }
 0x15a   :  { %2360 = vmatprep.subr.bf16.mxu1 %v6074_v3  ;;  %v6131_v3 = vld [vmem:[#allocation10 + $0x2ec] ss:$12 sps:$4 sm:$0xff]  }
 0x15c   :  { %2388 = vmatpush1.bf16.msra.mxu0 %v6075_v8  ;;  %v6132_v8 = vld [vmem:[#allocation10 + $0x150] ss:$12 sps:$4 sm:$0xff]  }
 0x15d   :  { %2361 = vmatpush2.bf16.msra.mxu1 %v6072_v7  ;;  %4389 = vmatprep.subr.bf16.mxu0 %v6080_v10  ;;  %v6134_v7 = vld [vmem:[#allocation10 + $0x154] ss:$12 sps:$4 sm:$0xff]   ;;  %v6135_v10 = vld [vmem:[#allocation10 + $0x2d0] ss:$12 sps:$4 sm:$0xff]  }
 0x15e   :  { %4432 = vmatprep.subr.bf16.mxu1 %v6083_v11  ;;  %v6140_v11 = vld [vmem:[#allocation10 + $0x13c] ss:$12 sps:$4 sm:$0xff]  }
 0x15f   :  { %v6718_v25 = vpop.f32.mrf.mxu0  ;;  %2406 = vmatmul.mubr.bf16.vlgmr.msra.gmra.mxu0 %v6678_v17 }
 0x160   :  { %v6716_v24 = vpop.f32.mrf.mxu1  ;;  %2363 = vmatmul.mubr.bf16.vlgmr.msra.gmra.mxu1 %v6696_v26  ;;  %4390 = vmatpush1.bf16.msra.mxu0 %v6078_v14  ;;  %v6093_v26 = vld [vmem:[#allocation10 + $0x1f8] ss:$12 sps:$4 sm:$0xff]   ;;  %v6143_v14 = vld [vmem:[#allocation10 + $0x2bc] ss:$12 sps:$4 sm:$0xff]  }
 0x161   :  { %4421 = vmatprep.mubr.bf16.mxu0 %v6711_v22  ;;  %4433 = vmatpush1.bf16.msra.mxu1 %v6081_v19  ;;  %v2065_v29 = vpop.f32.mrf.mxu0  ;;  %v6141_v19 = vld [vmem:[#allocation10 + $0x2b8] ss:$12 sps:$4 sm:$0xff]  }
 0x162   :  { %v2022_v28 = vpop.f32.mrf.mxu1  ;;  %4391 = vmatprep.subr.bf16.mxu0 %v6086_v20  ;;  %4434 = vmatprep.subr.bf16.mxu1 %v6089_v35  ;;  %v6146_v20 = vld [vmem:[#allocation10 + $0x124] ss:$12 sps:$4 sm:$0xff]   ;;  %v6152_v35 = vld [vmem:[#allocation10 + $0x10c] ss:$12 sps:$4 sm:$0xff]  }
 0x163   :  { %v2023_v30 = vadd.f32 %v2022_v28, %v399_v23  ;;  %v6725_v34 = vpop.f32.mrf.mxu0  ;;  %v6155_v28 = vld [vmem:[#allocation10 + $0x28c] ss:$12 sps:$4 sm:$0xff]  }
 0x164   :  { %v6723_v33 = vpop.f32.mrf.mxu1  ;;  %4392 = vmatpush1.bf16.msra.mxu0 %v6084_v6  ;;  %v6147_v6 = vld [vmem:[#allocation10 + $0x2a0] ss:$12 sps:$4 sm:$0xff]  }
 0x165   :  { %v2066_v17 = vadd.f32 %v2065_v29, %v2023_v30  ;;  %4435 = vmatpush1.bf16.msra.mxu1 %v6087_v51  ;;  %4393 = vmatprep.subr.bf16.mxu0 %v6092_v27  ;;  %v2069_v41 = vpop.f32.mrf.mxu0  ;;  %v6731_v51 = vsub.s32 2, %v6687_v12  ;;  %v6150_v27 = vld [vmem:[#allocation10 + $0x108] ss:$12 sps:$4 sm:$0xff]  }
 0x166   :  { %v2026_v36 = vpop.f32.mrf.mxu1  ;;  %4436 = vmatprep.subr.bf16.mxu1 %v6095_v32  ;;  %v6153_v29 = vld [vmem:[#allocation10 + $0x288] ss:$12 sps:$4 sm:$0xff]  }
 0x167   :  { %v2027_v39 = vadd.f32 %v2026_v36, %v399_v23  ;;  %v2419_v46 = vmax.f32 %v2066_v17, 0.0  ;;  %v6149_v23 = vld [vmem:[#allocation10 + $0x2a4] ss:$12 sps:$4 sm:$0xff]   ;;  %v6158_v30 = vld [vmem:[#allocation10 + $0xf4] ss:$12 sps:$4 sm:$0xff]   ;;  %v395_v32 = vrot.slane %v6689_v16, %v6731_v51 }
 0x168   :  { %4394 = vmatpush1.bf16.msra.mxu0 %v6090_v31  ;;  %v6161_v31 = vld [vmem:[#allocation10 + $0x274] ss:$12 sps:$4 sm:$0xff]   ;;  %v6159_v17 = vld [vmem:[#allocation10 + $0x270] ss:$12 sps:$4 sm:$0xff]  }
 0x169   :  { %v2070_v43 = vadd.f32 %v2069_v41, %v2027_v39  ;;  %4437 = vmatpush1.bf16.msra.mxu1 %v6093_v26  ;;  %4395 = vmatprep.subr.bf16.mxu0 %v6098_v37  ;;  %v6156_v26 = vld [vmem:[#allocation10 + $0xf0] ss:$12 sps:$4 sm:$0xff]   ;;  %v2025_v37 = vadd.f32 %v6723_v33, %v395_v32  ;;  %v2021_v39 = vadd.f32 %v6716_v24, %v395_v32  ;;  %v6165_v41 = vld [vmem:[#allocation10 + $0x258] ss:$12 sps:$4 sm:$0xff]   ;;  %v6171_v33 = vld [vmem:[#allocation10 + $0x240] ss:$12 sps:$4 sm:$0xff]  }
 0x16a   :  { %4438 = vmatprep.subr.bf16.mxu1 %v6101_v38  ;;  %v6164_v36 = vld [vmem:[#allocation10 + $0xdc] ss:$12 sps:$4 sm:$0xff]   ;;  %v406_v24 = vsub.s32 5, %v6687_v12  ;;  %v6209_v32 = vld [vmem:[#allocation10 + $0x4b4] ss:$12 sps:$4 sm:$0xff]  }
 0x16b   :  { %v2431_v47 = vmax.f32 %v2070_v43, 0.0  ;;  %v6167_v38 = vld [vmem:[#allocation10 + $0x25c] ss:$12 sps:$4 sm:$0xff]   ;;  %v2068_v43 = vadd.f32 %v6725_v34, %v2025_v37 }
 0x16c   :  { %4396 = vmatpush1.bf16.msra.mxu0 %v6096_v40  ;;  %v6162_v40 = vld [vmem:[#allocation10 + $0xd8] ss:$12 sps:$4 sm:$0xff]   ;;  %v6177_v34 = vld [vmem:[#allocation10 + $0x528] ss:$12 sps:$4 sm:$0xff]  }
 0x16d   :  { %v6727_v48 = vpack.c.bf16 %v2431_v47, %v2419_v46  ;;  %4439 = vmatpush1.bf16.msra.mxu1 %v6099_v42  ;;  %4397 = vmatprep.subr.bf16.mxu0 %v6104_v44  ;;  %v6170_v42 = vld [vmem:[#allocation10 + $0xc4] ss:$12 sps:$4 sm:$0xff]   ;;  %v2064_v46 = vadd.f32 %v6718_v25, %v2021_v39  ;;  %v6176_v47 = vld [vmem:[#allocation10 + $0x3ac] ss:$12 sps:$4 sm:$0xff]   ;;  %v6215_v37 = vld [vmem:[#allocation10 + $0x49c] ss:$12 sps:$4 sm:$0xff]  }
 0x16e   :  { %4440 = vmatprep.subr.bf16.mxu1 %v6107_v45  ;;  %v6173_v44 = vld [vmem:[#allocation10 + $0x244] ss:$12 sps:$4 sm:$0xff]   ;;  %v6168_v45 = vld [vmem:[#allocation10 + $0xc0] ss:$12 sps:$4 sm:$0xff]  }
 0x16f   :  { %4464 = vmatprep.mubr.bf16.mxu1 %v6727_v48  ;;  %v6213_v39 = vld [vmem:[#allocation10 + $0x498] ss:$12 sps:$4 sm:$0xff]  }
 0x170   :  { %4398 = vmatpush1.bf16.msra.mxu0 %v6102_v49  ;;  %v6179_v49 = vld [vmem:[#allocation10 + $0x52c] ss:$12 sps:$4 sm:$0xff]  }
 0x171   :  { %4441 = vmatpush1.bf16.msra.mxu1 %v6105_v50  ;;  %4399 = vmatprep.subr.bf16.mxu0 %v6110_v52  ;;  %v2430_v50 = vmax.f32 %v2068_v43, 0.0  ;;  %v6174_v52 = vld [vmem:[#allocation10 + $0x3a8] ss:$12 sps:$4 sm:$0xff]   ;;  %v6219_v43 = vld [vmem:[#allocation10 + $0x480] ss:$12 sps:$4 sm:$0xff]  }
 0x172   :  { %4442 = vmatprep.subr.bf16.mxu1 %v6113_v53 }
 0x174   :  { %4400 = vmatpush1.bf16.msra.mxu0 %v6108_v55  ;;  %v2418_v55 = vmax.f32 %v2064_v46, 0.0  ;;  %v414_v46 = vsub.s32 7, %v6687_v12 }
 0x175   :  { %4443 = vmatpush1.bf16.msra.mxu1 %v6111_v56  ;;  %4401 = vmatprep.subr.bf16.mxu0 %v6116_v57  ;;  %v6182_v56 = vld [vmem:[#allocation10 + $0x394] ss:$12 sps:$4 sm:$0xff]   ;;  %v407_v57 = vrot.slane %v6689_v16, %v406_v24 }
 0x176   :  { %4444 = vmatprep.subr.bf16.mxu1 %v6119_v58  ;;  %v6742_v25 = vpack.c.bf16 %v2430_v50, %v2418_v55  ;;  %v6180_v58 = vld [vmem:[#allocation10 + $0x390] ss:$12 sps:$4 sm:$0xff]   ;;  %v6465_v50 = vld [vmem:[#allocation9] sm:$0xff] }
 0x177   :  { %v415_v24 = vrot.slane %v6465_v50, %v414_v46  ;;  %v6258_v46 = vld [vmem:[#allocation10 + $0x3d8] ss:$12 sps:$4 sm:$0xff]  }
 0x178   :  { %4402 = vmatpush1.bf16.msra.mxu0 %v6114_v59  ;;  %v6185_v59 = vld [vmem:[#allocation10 + $0x514] ss:$12 sps:$4 sm:$0xff]  }
 0x179   :  { %4445 = vmatpush1.bf16.msra.mxu1 %v6117_v60  ;;  %4403 = vmatprep.subr.bf16.mxu0 %v6122_v61 }
 0x17a   :  { %4446 = vmatprep.subr.bf16.mxu1 %v6125_v62  ;;  %v6183_v62 = vld [vmem:[#allocation10 + $0x510] ss:$12 sps:$4 sm:$0xff]  }
 0x17c   :  { %4404 = vmatpush1.bf16.msra.mxu0 %v6120_v63 }
 0x17d   :  { %4447 = vmatpush1.bf16.msra.mxu1 %v6123_v1  ;;  %4405 = vmatprep.subr.bf16.mxu0 %v6128_v2  ;;  %v6188_v1 = vld [vmem:[#allocation10 + $0x37c] ss:$12 sps:$4 sm:$0xff]  }
 0x17e   :  { %4448 = vmatprep.subr.bf16.mxu1 %v6131_v3  ;;  %v6191_v3 = vld [vmem:[#allocation10 + $0x4fc] ss:$12 sps:$4 sm:$0xff]  }
 0x180   :  { %4406 = vmatpush2.bf16.msra.mxu0 %v6126_v4  ;;  %v6740_v53 = vpop.f32.mrf.mxu1 }
 0x181   :  { %4449 = vmatpush2.bf16.msra.mxu1 %v6129_v5  ;;  %4407 = vmatprep.subr.bf16.mxu0 %v6134_v7  ;;  %v6186_v5 = vld [vmem:[#allocation10 + $0x378] ss:$12 sps:$4 sm:$0xff]  }
 0x182   :  { %4450 = vmatprep.subr.bf16.mxu1 %v6137_v9  ;;  %v2151_v60 = vpop.f32.mrf.mxu1  ;;  %v6189_v7 = vld [vmem:[#allocation10 + $0x4f8] ss:$12 sps:$4 sm:$0xff]  }
 0x183   :  { %v6194_v9 = vld [vmem:[#allocation10 + $0x364] ss:$12 sps:$4 sm:$0xff]  }
 0x184   :  { %4408 = vmatpush2.bf16.msra.mxu0 %v6132_v8  ;;  %v6749_v4 = vpop.f32.mrf.mxu1 }
 0x185   :  { %4451 = vmatpush2.bf16.msra.mxu1 %v6135_v10  ;;  %4409 = vmatprep.subr.bf16.mxu0 %v6140_v11 }
 0x186   :  { %4452 = vmatprep.subr.bf16.mxu1 %v6143_v14  ;;  %v2155_v14 = vpop.f32.mrf.mxu1 }
 0x188   :  { %4410 = vmatpush2.bf16.msra.mxu0 %v6138_v13  ;;  %v6197_v13 = vld [vmem:[#allocation10 + $0x4e4] ss:$12 sps:$4 sm:$0xff]  }
 0x189   :  { %4453 = vmatpush2.bf16.msra.mxu1 %v6141_v19  ;;  %4411 = vmatprep.subr.bf16.mxu0 %v6146_v20  ;;  %v6192_v19 = vld [vmem:[#allocation10 + $0x360] ss:$12 sps:$4 sm:$0xff]  }
 0x18a   :  { %4454 = vmatprep.subr.bf16.mxu1 %v6149_v23  ;;  %v6200_v23 = vld [vmem:[#allocation10 + $0x34c] ss:$12 sps:$4 sm:$0xff]  }
 0x18c   :  { %4412 = vmatpush2.bf16.msra.mxu0 %v6144_v21  ;;  %v6195_v21 = vld [vmem:[#allocation10 + $0x4e0] ss:$12 sps:$4 sm:$0xff]  }
 0x18d   :  { %4455 = vmatpush2.bf16.msra.mxu1 %v6147_v6  ;;  %4413 = vmatprep.subr.bf16.mxu0 %v6152_v35 }
 0x18e   :  { %4456 = vmatprep.subr.bf16.mxu1 %v6155_v28  ;;  %v6203_v28 = vld [vmem:[#allocation10 + $0x4cc] ss:$12 sps:$4 sm:$0xff]  }
 0x190   :  { %4414 = vmatpush2.bf16.msra.mxu0 %v6150_v27  ;;  %v6198_v27 = vld [vmem:[#allocation10 + $0x348] ss:$12 sps:$4 sm:$0xff]  }
 0x191   :  { %4457 = vmatpush2.bf16.msra.mxu1 %v6153_v29  ;;  %4415 = vmatprep.subr.bf16.mxu0 %v6158_v30  ;;  %v6201_v29 = vld [vmem:[#allocation10 + $0x4c8] ss:$12 sps:$4 sm:$0xff]  }
 0x192   :  { %4458 = vmatprep.subr.bf16.mxu1 %v6161_v31  ;;  %v6206_v31 = vld [vmem:[#allocation10 + $0x334] ss:$12 sps:$4 sm:$0xff]  }
 0x194   :  { %4416 = vmatpush2.bf16.msra.mxu0 %v6156_v26  ;;  %v6204_v26 = vld [vmem:[#allocation10 + $0x330] ss:$12 sps:$4 sm:$0xff]  }
 0x195   :  { %4459 = vmatpush2.bf16.msra.mxu1 %v6159_v17  ;;  %4417 = vmatprep.subr.bf16.mxu0 %v6164_v36  ;;  %v6207_v17 = vld [vmem:[#allocation10 + $0x4b0] ss:$12 sps:$4 sm:$0xff]  }
 0x196   :  { %4460 = vmatprep.subr.bf16.mxu1 %v6167_v38  ;;  %v6212_v36 = vld [vmem:[#allocation10 + $0x31c] ss:$12 sps:$4 sm:$0xff]   ;;  %v6210_v38 = vld [vmem:[#allocation10 + $0x318] ss:$12 sps:$4 sm:$0xff]  }
 0x198   :  { %4418 = vmatpush2.bf16.msra.mxu0 %v6162_v40  ;;  %v6218_v40 = vld [vmem:[#allocation10 + $0x304] ss:$12 sps:$4 sm:$0xff]  }
 0x199   :  { %4461 = vmatpush2.bf16.msra.mxu1 %v6165_v41  ;;  %4419 = vmatprep.subr.bf16.mxu0 %v6170_v42  ;;  %v6221_v41 = vld [vmem:[#allocation10 + $0x484] ss:$12 sps:$4 sm:$0xff]   ;;  %v6216_v42 = vld [vmem:[#allocation10 + $0x300] ss:$12 sps:$4 sm:$0xff]  }
 0x19a   :  { %4462 = vmatprep.subr.bf16.mxu1 %v6173_v44  ;;  %v6224_v44 = vld [vmem:[#allocation10 + $0x46c] ss:$12 sps:$4 sm:$0xff]  }
 0x19c   :  { %4420 = vmatpush2.bf16.msra.mxu0 %v6168_v45  ;;  %v6227_v45 = vld [vmem:[#allocation10 + $0x5ec] ss:$12 sps:$4 sm:$0xff]  }
 0x19d   :  { %4463 = vmatpush2.bf16.msra.mxu1 %v6171_v33  ;;  %4475 = vmatprep.subr.bf16.mxu0 %v6176_v47  ;;  %v6222_v33 = vld [vmem:[#allocation10 + $0x468] ss:$12 sps:$4 sm:$0xff]  }
 0x19e   :  { %4518 = vmatprep.subr.bf16.mxu1 %v6179_v49  ;;  %v6225_v47 = vld [vmem:[#allocation10 + $0x5e8] ss:$12 sps:$4 sm:$0xff]  }
 0x19f   :  { %v6745_v61 = vpop.f32.mrf.mxu0  ;;  %4422 = vmatmul.mubr.bf16.vlgmr.msra.gmra.mxu0 %v6702_v0  ;;  %v6230_v49 = vld [vmem:[#allocation10 + $0x454] ss:$12 sps:$4 sm:$0xff]  }
 0x1a0   :  { %4465 = vmatmul.mubr.bf16.vlgmr.msra.gmra.mxu1 %v6742_v25  ;;  %4476 = vmatpush1.bf16.msra.mxu0 %v6174_v52  ;;  %v6233_v52 = vld [vmem:[#allocation10 + $0x5d4] ss:$12 sps:$4 sm:$0xff]  }
 0x1a1   :  { %4519 = vmatpush1.bf16.msra.mxu1 %v6177_v34  ;;  %v2108_v63 = vpop.f32.mrf.mxu0  ;;  %4477 = vmatprep.subr.bf16.mxu0 %v6182_v56  ;;  %v6228_v56 = vld [vmem:[#allocation10 + $0x450] ss:$12 sps:$4 sm:$0xff]  }
 0x1a2   :  { %v2109_v2 = vadd.f32 %v2108_v63, %v407_v57  ;;  %4520 = vmatprep.subr.bf16.mxu1 %v6185_v59  ;;  %v6231_v59 = vld [vmem:[#allocation10 + $0x5d0] ss:$12 sps:$4 sm:$0xff]  }
 0x1a3   :  { %v6751_v16 = vpop.f32.mrf.mxu0  ;;  %v6239_v63 = vld [vmem:[#allocation10 + $0x5bc] ss:$12 sps:$4 sm:$0xff]  }
 0x1a4   :  { %4478 = vmatpush1.bf16.msra.mxu0 %v6180_v58  ;;  %v2152_v10 = vadd.f32 %v2151_v60, %v2109_v2  ;;  %v6236_v60 = vld [vmem:[#allocation10 + $0x43c] ss:$12 sps:$4 sm:$0xff]  }
 0x1a5   :  { %4521 = vmatpush1.bf16.msra.mxu1 %v6183_v62  ;;  %v2112_v8 = vpop.f32.mrf.mxu0  ;;  %4479 = vmatprep.subr.bf16.mxu0 %v6188_v1 }
 0x1a6   :  { %v2113_v11 = vadd.f32 %v2112_v8, %v407_v57  ;;  %4522 = vmatprep.subr.bf16.mxu1 %v6191_v3  ;;  %v2421_v6 = vmax.f32 %v2152_v10, 0.0  ;;  %v6234_v3 = vld [vmem:[#allocation10 + $0x438] ss:$12 sps:$4 sm:$0xff]  }
 0x1a7   :  { %v6242_v8 = vld [vmem:[#allocation10 + $0x424] ss:$12 sps:$4 sm:$0xff]  }
 0x1a8   :  { %v2156_v20 = vadd.f32 %v2155_v14, %v2113_v11  ;;  %4480 = vmatpush1.bf16.msra.mxu0 %v6186_v5  ;;  %v6237_v5 = vld [vmem:[#allocation10 + $0x5b8] ss:$12 sps:$4 sm:$0xff]   ;;  %v410_v14 = vsub.s32 6, %v6687_v12 }
 0x1a9   :  { %4523 = vmatpush1.bf16.msra.mxu1 %v6189_v7  ;;  %4481 = vmatprep.subr.bf16.mxu0 %v6194_v9  ;;  %v6245_v11 = vld [vmem:[#allocation10 + $0x5a4] ss:$12 sps:$4 sm:$0xff]  }
 0x1aa   :  { %v2433_v35 = vmax.f32 %v2156_v20, 0.0  ;;  %4524 = vmatprep.subr.bf16.mxu1 %v6197_v13  ;;  %v402_v13 = vsub.s32 4, %v6687_v12 }
 0x1ac   :  { %4482 = vmatpush1.bf16.msra.mxu0 %v6192_v19  ;;  %v6753_v30 = vpack.c.bf16 %v2433_v35, %v2421_v6  ;;  %v6248_v6 = vld [vmem:[#allocation10 + $0x40c] ss:$12 sps:$4 sm:$0xff]  }
 0x1ad   :  { %4525 = vmatpush1.bf16.msra.mxu1 %v6195_v21  ;;  %4483 = vmatprep.subr.bf16.mxu0 %v6200_v23  ;;  %v6240_v21 = vld [vmem:[#allocation10 + $0x420] ss:$12 sps:$4 sm:$0xff]  }
 0x1ae   :  { %4507 = vmatprep.mubr.bf16.mxu0 %v6753_v30  ;;  %4526 = vmatprep.subr.bf16.mxu1 %v6203_v28  ;;  %v6243_v23 = vld [vmem:[#allocation10 + $0x5a0] ss:$12 sps:$4 sm:$0xff]   ;;  %v6246_v28 = vld [vmem:[#allocation10 + $0x408] ss:$12 sps:$4 sm:$0xff]  }
 0x1b0   :  { %4484 = vmatpush1.bf16.msra.mxu0 %v6198_v27 }
 0x1b1   :  { %4527 = vmatpush1.bf16.msra.mxu1 %v6201_v29  ;;  %4485 = vmatprep.subr.bf16.mxu0 %v6206_v31  ;;  %v6251_v29 = vld [vmem:[#allocation10 + $0x58c] ss:$12 sps:$4 sm:$0xff]   ;;  %v6249_v31 = vld [vmem:[#allocation10 + $0x588] ss:$12 sps:$4 sm:$0xff]  }
 0x1b2   :  { %4528 = vmatprep.subr.bf16.mxu1 %v6209_v32 }
 0x1b4   :  { %4486 = vmatpush1.bf16.msra.mxu0 %v6204_v26  ;;  %v6254_v26 = vld [vmem:[#allocation10 + $0x3f4] ss:$12 sps:$4 sm:$0xff]  }
 0x1b5   :  { %4529 = vmatpush1.bf16.msra.mxu1 %v6207_v17  ;;  %4487 = vmatprep.subr.bf16.mxu0 %v6212_v36  ;;  %v6257_v17 = vld [vmem:[#allocation10 + $0x574] ss:$12 sps:$4 sm:$0xff]   ;;  %v403_v36 = vrot.slane %v6465_v50, %v402_v13  ;;  %v6302_v13 = vld [vmem:[#allocation10 + $0x7e4] ss:$12 sps:$4 sm:$0xff]  }
 0x1b6   :  { %4530 = vmatprep.subr.bf16.mxu1 %v6215_v37  ;;  %v411_v37 = vrot.slane %v6465_v50, %v410_v14  ;;  %v6269_v50 = vld [vmem:[#allocation10 + $0x544] ss:$12 sps:$4 sm:$0xff]   ;;  %v6279_v14 = vld [vmem:[#allocation10 + $0x660] ss:$12 sps:$4 sm:$0xff]  }
 0x1b8   :  { %4488 = vmatpush1.bf16.msra.mxu0 %v6210_v38  ;;  %v6252_v38 = vld [vmem:[#allocation10 + $0x3f0] ss:$12 sps:$4 sm:$0xff]  }
 0x1b9   :  { %4531 = vmatpush1.bf16.msra.mxu1 %v6213_v39  ;;  %4489 = vmatprep.subr.bf16.mxu0 %v6218_v40  ;;  %v2111_v39 = vadd.f32 %v6751_v16, %v403_v36  ;;  %v6255_v40 = vld [vmem:[#allocation10 + $0x570] ss:$12 sps:$4 sm:$0xff]  }
 0x1ba   :  { %4532 = vmatprep.subr.bf16.mxu1 %v6221_v41  ;;  %v6260_v41 = vld [vmem:[#allocation10 + $0x3dc] ss:$12 sps:$4 sm:$0xff]  }
 0x1bc   :  { %4490 = vmatpush1.bf16.msra.mxu0 %v6216_v42 }
 0x1bd   :  { %4533 = vmatpush1.bf16.msra.mxu1 %v6219_v43  ;;  %4491 = vmatprep.subr.bf16.mxu0 %v6224_v44  ;;  %v6263_v43 = vld [vmem:[#allocation10 + $0x55c] ss:$12 sps:$4 sm:$0xff]   ;;  %v2107_v44 = vadd.f32 %v6745_v61, %v403_v36  ;;  %v6305_v36 = vld [vmem:[#allocation10 + $0x604] ss:$12 sps:$4 sm:$0xff]  }
 0x1be   :  { %4534 = vmatprep.subr.bf16.mxu1 %v6227_v45 }
 0x1bf   :  { %v6759_v55 = vpop.f32.mrf.mxu0 }
 0x1c0   :  { %v6757_v34 = vpop.f32.mrf.mxu1  ;;  %4492 = vmatpush2.bf16.msra.mxu0 %v6222_v33  ;;  %v2154_v33 = vadd.f32 %v6749_v4, %v2111_v39  ;;  %v6284_v4 = vld [vmem:[#allocation10 + $0x82c] ss:$12 sps:$4 sm:$0xff]  }
 0x1c1   :  { %4535 = vmatpush2.bf16.msra.mxu1 %v6225_v47  ;;  %v2237_v58 = vpop.f32.mrf.mxu0  ;;  %4493 = vmatprep.subr.bf16.mxu0 %v6230_v49  ;;  %v2193_v45 = vadd.f32 %v6757_v34, %v411_v37  ;;  %v6261_v47 = vld [vmem:[#allocation10 + $0x558] ss:$12 sps:$4 sm:$0xff]   ;;  %v6267_v34 = vld [vmem:[#allocation10 + $0x540] ss:$12 sps:$4 sm:$0xff]  }
 0x1c2   :  { %v2194_v57 = vpop.f32.mrf.mxu1  ;;  %4536 = vmatprep.subr.bf16.mxu1 %v6233_v52  ;;  %v6266_v49 = vld [vmem:[#allocation10 + $0x3c4] ss:$12 sps:$4 sm:$0xff]   ;;  %v2432_v61 = vmax.f32 %v2154_v33, 0.0  ;;  %v6303_v39 = vld [vmem:[#allocation10 + $0x600] ss:$12 sps:$4 sm:$0xff]  }
 0x1c3   :  { %v2195_v62 = vadd.f32 %v2194_v57, %v415_v24  ;;  %v2239_v2 = vpop.f32.mrf.mxu0  ;;  %v2236_v52 = vadd.f32 %v6759_v55, %v2193_v45  ;;  %v6272_v57 = vld [vmem:[#allocation10 + $0x6ac] ss:$12 sps:$4 sm:$0xff]   ;;  %v6282_v55 = vld [vmem:[#allocation10 + $0x828] ss:$12 sps:$4 sm:$0xff]   ;;  %v6780_v45 = vld [vmem:[#allocation9 + $0x8] sm:$0xf] }
 0x1c4   :  { %v2196_v1 = vpop.f32.mrf.mxu1  ;;  %4494 = vmatpush2.bf16.msra.mxu0 %v6228_v56  ;;  %v6264_v56 = vld [vmem:[#allocation10 + $0x3c0] ss:$12 sps:$4 sm:$0xff]   ;;  %v6330_v33 = vld [vmem:[#allocation10 + $0x8e8] ss:$12 sps:$4 sm:$0xff]  }
 0x1c5   :  { %4537 = vmatpush2.bf16.msra.mxu1 %v6231_v59  ;;  %4495 = vmatprep.subr.bf16.mxu0 %v6236_v60  ;;  %v2238_v9 = vadd.f32 %v2237_v58, %v2195_v62  ;;  %v2241_v19 = vpop.f32.mrf.mxu0  ;;  %v2197_v42 = vadd.f32 %v2196_v1, %v411_v37  ;;  %v2422_v60 = vmax.f32 %v2236_v52, 0.0  ;;  %v6270_v62 = vld [vmem:[#allocation10 + $0x6a8] ss:$12 sps:$4 sm:$0xff]   ;;  %v6318_v37 = vld [vmem:[#allocation10 + $0x798] ss:$12 sps:$4 sm:$0xff]  }
 0x1c6   :  { %v2198_v7 = vpop.f32.mrf.mxu1  ;;  %4538 = vmatprep.subr.bf16.mxu1 %v6239_v63 }
 0x1c7   :  { %v2199_v10 = vadd.f32 %v2198_v7, %v415_v24  ;;  %v2423_v35 = vmax.f32 %v2238_v9, 0.0  ;;  %v2240_v16 = vadd.f32 %v2239_v2, %v2197_v42  ;;  %v2150_v24 = vadd.f32 %v6740_v53, %v2107_v44  ;;  %v6275_v53 = vld [vmem:[#allocation10 + $0x694] ss:$12 sps:$4 sm:$0xff]   ;;  %v6288_v7 = vld [vmem:[#allocation10 + $0x810] ss:$12 sps:$4 sm:$0xff]  }
 0x1c8   :  { %4496 = vmatpush2.bf16.msra.mxu0 %v6234_v3  ;;  %v6290_v2 = vld [vmem:[#allocation10 + $0x814] ss:$12 sps:$4 sm:$0xff]   ;;  %v6273_v3 = vld [vmem:[#allocation10 + $0x690] ss:$12 sps:$4 sm:$0xff]   ;;  %v6276_v9 = vld [vmem:[#allocation10 + $0x678] ss:$12 sps:$4 sm:$0xff]  }
 0x1c9   :  { %v2242_v20 = vadd.f32 %v2241_v19, %v2199_v10  ;;  %4539 = vmatpush2.bf16.msra.mxu1 %v6237_v5  ;;  %4497 = vmatprep.subr.bf16.mxu0 %v6242_v8  ;;  %v2434_v58 = vmax.f32 %v2240_v16, 0.0  ;;  %v2420_v59 = vmax.f32 %v2150_v24, 0.0  ;;  %v6278_v5 = vld [vmem:[#allocation10 + $0x67c] ss:$12 sps:$4 sm:$0xff]   ;;  %v6281_v10 = vld [vmem:[#allocation10 + $0x664] ss:$12 sps:$4 sm:$0xff]  }
 0x1ca   :  { %4540 = vmatprep.subr.bf16.mxu1 %v6245_v11  ;;  %v6296_v8 = vld [vmem:[#allocation10 + $0x7fc] ss:$12 sps:$4 sm:$0xff]   ;;  %v6294_v11 = vld [vmem:[#allocation10 + $0x7f8] ss:$12 sps:$4 sm:$0xff]  }
 0x1cb   :  { %v2435_v27 = vmax.f32 %v2242_v20, 0.0  ;;  %v6772_v63 = vpack.c.bf16 %v2432_v61, %v2420_v59  ;;  %v6774_v1 = vpack.c.bf16 %v2434_v58, %v2422_v60  ;;  %v6287_v19 = vld [vmem:[#allocation10 + $0x64c] ss:$12 sps:$4 sm:$0xff]   ;;  %v6309_v44 = vld [vmem:[#allocation10 + $0x768] ss:$12 sps:$4 sm:$0xff]  }
 0x1cc   :  { %4498 = vmatpush2.bf16.msra.mxu0 %v6240_v21  ;;  %v6300_v20 = vld [vmem:[#allocation10 + $0x7e0] ss:$12 sps:$4 sm:$0xff]   ;;  %v6315_v24 = vld [vmem:[#allocation10 + $0x750] ss:$12 sps:$4 sm:$0xff]   ;;  %v6321_v59 = vld [vmem:[#allocation10 + $0x738] ss:$12 sps:$4 sm:$0xff]  }
 0x1cd   :  { %v6763_v32 = vpack.c.bf16 %v2435_v27, %v2423_v35  ;;  %4541 = vmatpush2.bf16.msra.mxu1 %v6243_v23  ;;  %4499 = vmatprep.subr.bf16.mxu0 %v6248_v6  ;;  %v6308_v21 = vld [vmem:[#allocation10 + $0x7cc] ss:$12 sps:$4 sm:$0xff]   ;;  %v6285_v23 = vld [vmem:[#allocation10 + $0x648] ss:$12 sps:$4 sm:$0xff]   ;;  %v6336_v61 = vld [vmem:[#allocation10 + $0x8d0] ss:$12 sps:$4 sm:$0xff]  }
 0x1ce   :  { %4542 = vmatprep.subr.bf16.mxu1 %v6251_v29  ;;  %v6293_v6 = vld [vmem:[#allocation10 + $0x634] ss:$12 sps:$4 sm:$0xff]   ;;  %v6299_v29 = vld [vmem:[#allocation10 + $0x61c] ss:$12 sps:$4 sm:$0xff]   ;;  %v6332_v42 = vld [vmem:[#allocation10 + $0x8ec] ss:$12 sps:$4 sm:$0xff]  }
 0x1cf   :  { %4550 = vmatprep.mubr.bf16.mxu1 %v6763_v32  ;;  %v6306_v35 = vld [vmem:[#allocation10 + $0x7c8] ss:$12 sps:$4 sm:$0xff]  }
 0x1d0   :  { %4500 = vmatpush2.bf16.msra.mxu0 %v6246_v28  ;;  %v6314_v27 = vld [vmem:[#allocation10 + $0x7b4] ss:$12 sps:$4 sm:$0xff]   ;;  %v6291_v28 = vld [vmem:[#allocation10 + $0x630] ss:$12 sps:$4 sm:$0xff]  }
 0x1d1   :  { %4543 = vmatpush2.bf16.msra.mxu1 %v6249_v31  ;;  %4501 = vmatprep.subr.bf16.mxu0 %v6254_v26  ;;  %v6312_v31 = vld [vmem:[#allocation10 + $0x7b0] ss:$12 sps:$4 sm:$0xff]  }
 0x1d2   :  { %4544 = vmatprep.subr.bf16.mxu1 %v6257_v17  ;;  %v6320_v26 = vld [vmem:[#allocation10 + $0x79c] ss:$12 sps:$4 sm:$0xff]   ;;  %v6297_v17 = vld [vmem:[#allocation10 + $0x618] ss:$12 sps:$4 sm:$0xff]  }
 0x1d4   :  { %4502 = vmatpush2.bf16.msra.mxu0 %v6252_v38  ;;  %v6326_v38 = vld [vmem:[#allocation10 + $0x784] ss:$12 sps:$4 sm:$0xff]  }
 0x1d5   :  { %4545 = vmatpush2.bf16.msra.mxu1 %v6255_v40  ;;  %4503 = vmatprep.subr.bf16.mxu0 %v6260_v41  ;;  %v6311_v40 = vld [vmem:[#allocation10 + $0x76c] ss:$12 sps:$4 sm:$0xff]  }
 0x1d6   :  { %4546 = vmatprep.subr.bf16.mxu1 %v6263_v43  ;;  %v6324_v41 = vld [vmem:[#allocation10 + $0x780] ss:$12 sps:$4 sm:$0xff]  }
 0x1d8   :  { %4504 = vmatpush2.bf16.msra.mxu0 %v6258_v46  ;;  %v6317_v46 = vld [vmem:[#allocation10 + $0x754] ss:$12 sps:$4 sm:$0xff]  }
 0x1d9   :  { %4547 = vmatpush2.bf16.msra.mxu1 %v6261_v47  ;;  %4505 = vmatprep.subr.bf16.mxu0 %v6266_v49  ;;  %v423_v47 = vrot.slane %v6780_v45, %v6705_v54  ;;  %v6338_v49 = vld [vmem:[#allocation10 + $0x8d4] ss:$12 sps:$4 sm:$0xff]  }
 0x1da   :  { %4548 = vmatprep.subr.bf16.mxu1 %v6269_v50 }
 0x1dc   :  { %4506 = vmatpush2.bf16.msra.mxu0 %v6264_v56  ;;  %v6323_v56 = vld [vmem:[#allocation10 + $0x73c] ss:$12 sps:$4 sm:$0xff]  }
 0x1dd   :  { %4549 = vmatpush2.bf16.msra.mxu1 %v6267_v34  ;;  %4561 = vmatprep.subr.bf16.mxu0 %v6272_v57  ;;  %v6344_v57 = vld [vmem:[#allocation10 + $0x8bc] ss:$12 sps:$4 sm:$0xff]  }
 0x1de   :  { %4604 = vmatprep.subr.bf16.mxu1 %v6284_v4 }
 0x1df   :  { %4508 = vmatmul.mubr.bf16.vlgmr.msra.gmra.mxu0 %v6772_v63 }
 0x1e0   :  { %4551 = vmatmul.mubr.bf16.vlgmr.msra.gmra.mxu1 %v6774_v1  ;;  %4562 = vmatpush1.bf16.msra.mxu0 %v6270_v62  ;;  %v6778_v43 = vpop.f32.mrf.mxu1  ;;  %v6329_v62 = vld [vmem:[#allocation10 + $0x724] ss:$12 sps:$4 sm:$0xff]  }
 0x1e1   :  { %4563 = vmatprep.subr.bf16.mxu0 %v6275_v53  ;;  %4605 = vmatpush1.bf16.msra.mxu1 %v6282_v55  ;;  %v6342_v53 = vld [vmem:[#allocation10 + $0x8b8] ss:$12 sps:$4 sm:$0xff]  }
 0x1e2   :  { %4606 = vmatprep.subr.bf16.mxu1 %v6290_v2  ;;  %v2323_v16 = vpop.f32.mrf.mxu1 }
 0x1e4   :  { %4564 = vmatpush1.bf16.msra.mxu0 %v6273_v3  ;;  %v2325_v58 = vpop.f32.mrf.mxu1  ;;  %v6350_v3 = vld [vmem:[#allocation10 + $0x8a4] ss:$12 sps:$4 sm:$0xff]  }
 0x1e5   :  { %4565 = vmatprep.subr.bf16.mxu0 %v6278_v5  ;;  %4607 = vmatpush1.bf16.msra.mxu1 %v6288_v7 }
 0x1e6   :  { %4608 = vmatprep.subr.bf16.mxu1 %v6296_v8  ;;  %v2327_v5 = vpop.f32.mrf.mxu1  ;;  %v6327_v8 = vld [vmem:[#allocation10 + $0x720] ss:$12 sps:$4 sm:$0xff]  }
 0x1e8   :  { %4566 = vmatpush1.bf16.msra.mxu0 %v6276_v9  ;;  %v6335_v9 = vld [vmem:[#allocation10 + $0x70c] ss:$12 sps:$4 sm:$0xff]  }
 0x1e9   :  { %4567 = vmatprep.subr.bf16.mxu0 %v6281_v10  ;;  %4609 = vmatpush1.bf16.msra.mxu1 %v6294_v11  ;;  %v6348_v10 = vld [vmem:[#allocation10 + $0x8a0] ss:$12 sps:$4 sm:$0xff]  }
 0x1ea   :  { %4610 = vmatprep.subr.bf16.mxu1 %v6302_v13 }
 0x1ec   :  { %4568 = vmatpush1.bf16.msra.mxu0 %v6279_v14  ;;  %v6356_v14 = vld [vmem:[#allocation10 + $0x88c] ss:$12 sps:$4 sm:$0xff]  }
 0x1ed   :  { %4569 = vmatprep.subr.bf16.mxu0 %v6287_v19  ;;  %4611 = vmatpush1.bf16.msra.mxu1 %v6300_v20  ;;  %v6333_v20 = vld [vmem:[#allocation10 + $0x708] ss:$12 sps:$4 sm:$0xff]  }
 0x1ee   :  { %4612 = vmatprep.subr.bf16.mxu1 %v6308_v21  ;;  %v6341_v21 = vld [vmem:[#allocation10 + $0x6f4] ss:$12 sps:$4 sm:$0xff]  }
 0x1f0   :  { %4570 = vmatpush1.bf16.msra.mxu0 %v6285_v23  ;;  %v6354_v23 = vld [vmem:[#allocation10 + $0x888] ss:$12 sps:$4 sm:$0xff]  }
 0x1f1   :  { %4571 = vmatprep.subr.bf16.mxu0 %v6293_v6  ;;  %4613 = vmatpush1.bf16.msra.mxu1 %v6306_v35  ;;  %v6361_v6 = vld [vmem:[#allocation10 + $0x874] ss:$12 sps:$4 sm:$0xff]   ;;  %v419_v35 = vrot.slane %v6780_v45, %v6692_v18 }
 0x1f2   :  { %4614 = vmatprep.subr.bf16.mxu1 %v6314_v27  ;;  %v6339_v27 = vld [vmem:[#allocation10 + $0x6f0] ss:$12 sps:$4 sm:$0xff]  }
 0x1f4   :  { %4572 = vmatpush1.bf16.msra.mxu0 %v6291_v28 }
 0x1f5   :  { %4573 = vmatprep.subr.bf16.mxu0 %v6299_v29  ;;  %4615 = vmatpush1.bf16.msra.mxu1 %v6312_v31  ;;  %v6347_v29 = vld [vmem:[#allocation10 + $0x6dc] ss:$12 sps:$4 sm:$0xff]  }
 0x1f6   :  { %4616 = vmatprep.subr.bf16.mxu1 %v6320_v26  ;;  %v6359_v31 = vld [vmem:[#allocation10 + $0x870] ss:$12 sps:$4 sm:$0xff]  }
 0x1f7   :  { %v6366_v26 = vld [vmem:[#allocation10 + $0x85c] ss:$12 sps:$4 sm:$0xff]  }
 0x1f8   :  { %4574 = vmatpush1.bf16.msra.mxu0 %v6297_v17 }
 0x1f9   :  { %4575 = vmatprep.subr.bf16.mxu0 %v6305_v36  ;;  %4617 = vmatpush1.bf16.msra.mxu1 %v6318_v37  ;;  %v6345_v36 = vld [vmem:[#allocation10 + $0x6d8] ss:$12 sps:$4 sm:$0xff]  }
 0x1fa   :  { %4618 = vmatprep.subr.bf16.mxu1 %v6326_v38  ;;  %v6353_v38 = vld [vmem:[#allocation10 + $0x6c4] ss:$12 sps:$4 sm:$0xff]  }
 0x1fc   :  { %4576 = vmatpush1.bf16.msra.mxu0 %v6303_v39  ;;  %v6364_v39 = vld [vmem:[#allocation10 + $0x858] ss:$12 sps:$4 sm:$0xff]  }
 0x1fd   :  { %4577 = vmatprep.subr.bf16.mxu0 %v6311_v40  ;;  %4619 = vmatpush1.bf16.msra.mxu1 %v6324_v41  ;;  %v6371_v40 = vld [vmem:[#allocation10 + $0x844] ss:$12 sps:$4 sm:$0xff]  }
 0x1fe   :  { %4620 = vmatprep.subr.bf16.mxu1 %v6332_v42  ;;  %v6351_v42 = vld [vmem:[#allocation10 + $0x6c0] ss:$12 sps:$4 sm:$0xff]  }
 0x1ff   :  { %v2278_v50 = vpop.f32.mrf.mxu0 }
 0x200   :  { %4578 = vmatpush2.bf16.msra.mxu0 %v6309_v44  ;;  %v2279_v17 = vadd.f32 %v2278_v50, %v419_v35 }
 0x201   :  { %v2280_v52 = vpop.f32.mrf.mxu0  ;;  %4579 = vmatprep.subr.bf16.mxu0 %v6317_v46  ;;  %4621 = vmatpush2.bf16.msra.mxu1 %v6330_v33  ;;  %v6357_v46 = vld [vmem:[#allocation10 + $0x170] ss:$12 sps:$4 sm:$0xff]   ;;  %v6369_v33 = vld [vmem:[#allocation10 + $0x840] ss:$12 sps:$4 sm:$0xff]  }
 0x202   :  { %v2281_v34 = vadd.f32 %v2280_v52, %v423_v47  ;;  %4622 = vmatprep.subr.bf16.mxu1 %v6338_v49  ;;  %v2322_v41 = vadd.f32 %v6778_v43, %v2279_v17  ;;  %v431_v43 = vrot.slane %v6780_v45, %v398_v15  ;;  %v427_v52 = vrot.slane %v6780_v45, %v6731_v51  ;;  %v6383_v17 = vld [vmem:[#allocation10 + $0xe0] ss:$12 sps:$4 sm:$0xff]  }
 0x203   :  { %v2282_v4 = vpop.f32.mrf.mxu0 }
 0x204   :  { %4580 = vmatpush2.bf16.msra.mxu0 %v6315_v24  ;;  %v2324_v55 = vadd.f32 %v2323_v16, %v2281_v34  ;;  %v2283_v28 = vadd.f32 %v2282_v4, %v419_v35  ;;  %v2424_v49 = vmax.f32 %v2322_v41, 0.0  ;;  %v6358_v16 = vld [vmem:[#allocation10 + $0xb0] ss:$12 sps:$4 sm:$0xff]   ;;  %v6362_v24 = vld [vmem:[#allocation10 + $0x158] ss:$12 sps:$4 sm:$0xff]  }
 0x205   :  { %v2284_v60 = vpop.f32.mrf.mxu0  ;;  %4581 = vmatprep.subr.bf16.mxu0 %v6323_v56  ;;  %4623 = vmatpush2.bf16.msra.mxu1 %v6336_v61  ;;  %v6363_v34 = vld [vmem:[#allocation10 + $0x98] ss:$12 sps:$4 sm:$0xff]   ;;  %v6367_v4 = vld [vmem:[#allocation10 + $0x140] ss:$12 sps:$4 sm:$0xff]   ;;  %v6389_v41 = vld [vmem:[#allocation10 + $0x8] ss:$12 sps:$4 sm:$0xff]  }
 0x206   :  { %v2285_v2 = vadd.f32 %v2284_v60, %v423_v47  ;;  %4624 = vmatprep.subr.bf16.mxu1 %v6344_v57  ;;  %v2425_v11 = vmax.f32 %v2324_v55, 0.0  ;;  %v2326_v37 = vadd.f32 %v2325_v58, %v2283_v28  ;;  %v6374_v47 = vld [vmem:[#allocation10 + $0x2f0] ss:$12 sps:$4 sm:$0xff]   ;;  %v6372_v55 = vld [vmem:[#allocation10 + $0x128] ss:$12 sps:$4 sm:$0xff]  }
 0x207   :  { %v6379_v28 = vld [vmem:[#allocation10 + $0xf8] ss:$12 sps:$4 sm:$0xff]  }
 0x208   :  { %v2328_v7 = vadd.f32 %v2327_v5, %v2285_v2  ;;  %4582 = vmatpush2.bf16.msra.mxu0 %v6321_v59  ;;  %v2436_v44 = vmax.f32 %v2326_v37, 0.0  ;;  %v6385_v37 = vld [vmem:[#allocation10 + $0x20] ss:$12 sps:$4 sm:$0xff]  }
 0x209   :  { %4583 = vmatprep.subr.bf16.mxu0 %v6329_v62  ;;  %4625 = vmatpush2.bf16.msra.mxu1 %v6342_v53  ;;  %v6368_v53 = vld [vmem:[#allocation10 + $0x80] ss:$12 sps:$4 sm:$0xff]  }
 0x20a   :  { %v2437_v13 = vmax.f32 %v2328_v7, 0.0  ;;  %4626 = vmatprep.subr.bf16.mxu1 %v6350_v3  ;;  %v6790_v50 = vpack.c.bf16 %v2436_v44, %v2424_v49  ;;  %v6391_v44 = vld [vmem:[#allocation10 + $0x1d0] ss:$12 sps:$4 sm:$0xff]   ;;  %v6395_v49 = vld [vmem:[#allocation10 + $0x1b8] ss:$12 sps:$4 sm:$0xff]  }
 0x20c   :  { %4584 = vmatpush2.bf16.msra.mxu0 %v6327_v8  ;;  %v6784_v19 = vpack.c.bf16 %v2437_v13, %v2425_v11  ;;  %v6375_v11 = vld [vmem:[#allocation10 + $0x110] ss:$12 sps:$4 sm:$0xff]  }
 0x20d   :  { %4585 = vmatprep.subr.bf16.mxu0 %v6335_v9  ;;  %4627 = vmatpush2.bf16.msra.mxu1 %v6348_v10  ;;  %v6373_v9 = vld [vmem:[#allocation10 + $0x68] ss:$12 sps:$4 sm:$0xff]  }
 0x20e   :  { %4593 = vmatprep.mubr.bf16.mxu0 %v6784_v19  ;;  %4628 = vmatprep.subr.bf16.mxu1 %v6356_v14 }
 0x210   :  { %4586 = vmatpush2.bf16.msra.mxu0 %v6333_v20 }
 0x211   :  { %4587 = vmatprep.subr.bf16.mxu0 %v6341_v21  ;;  %4629 = vmatpush2.bf16.msra.mxu1 %v6354_v23  ;;  %v6376_v23 = vld [vmem:[#allocation10 + $0x230] ss:$12 sps:$4 sm:$0xff]  }
 0x212   :  { %4630 = vmatprep.subr.bf16.mxu1 %v6361_v6  ;;  %v6377_v6 = vld [vmem:[#allocation10 + $0x50] ss:$12 sps:$4 sm:$0xff]  }
 0x214   :  { %4588 = vmatpush2.bf16.msra.mxu0 %v6339_v27  ;;  %v6378_v27 = vld [vmem:[#allocation10 + $0x2d8] ss:$12 sps:$4 sm:$0xff]  }
 0x215   :  { %4589 = vmatprep.subr.bf16.mxu0 %v6347_v29  ;;  %4631 = vmatpush2.bf16.msra.mxu1 %v6359_v31  ;;  %v6380_v29 = vld [vmem:[#allocation10 + $0x218] ss:$12 sps:$4 sm:$0xff]  }
 0x216   :  { %4632 = vmatprep.subr.bf16.mxu1 %v6366_v26  ;;  %v6381_v31 = vld [vmem:[#allocation10 + $0x38] ss:$12 sps:$4 sm:$0xff]   ;;  %v6382_v26 = vld [vmem:[#allocation10 + $0x2c0] ss:$12 sps:$4 sm:$0xff]  }
 0x218   :  { %4590 = vmatpush2.bf16.msra.mxu0 %v6345_v36  ;;  %v6384_v36 = vld [vmem:[#allocation10 + $0x200] ss:$12 sps:$4 sm:$0xff]  }
 0x219   :  { %4591 = vmatprep.subr.bf16.mxu0 %v6353_v38  ;;  %4633 = vmatpush2.bf16.msra.mxu1 %v6364_v39  ;;  %v6386_v38 = vld [vmem:[#allocation10 + $0x2a8] ss:$12 sps:$4 sm:$0xff]  }
 0x21a   :  { %4634 = vmatprep.subr.bf16.mxu1 %v6371_v40  ;;  %v6387_v39 = vld [vmem:[#allocation10 + $0xc8] ss:$12 sps:$4 sm:$0xff]  }
 0x21b   :  { %v6388_v40 = vld [vmem:[#allocation10 + $0x1e8] ss:$12 sps:$4 sm:$0xff]  }
 0x21c   :  { %4592 = vmatpush2.bf16.msra.mxu0 %v6351_v42  ;;  %v6390_v42 = vld [vmem:[#allocation10 + $0x290] ss:$12 sps:$4 sm:$0xff]  }
 0x21d   :  { %5497 = vmatprep.subr.bf16.mxu0 %v6357_v46  ;;  %4635 = vmatpush2.bf16.msra.mxu1 %v6369_v33  ;;  %v6393_v46 = vld [vmem:[#allocation10 + $0x3b0] ss:$12 sps:$4 sm:$0xff]   ;;  %v6394_v33 = vld [vmem:[#allocation10 + $0x278] ss:$12 sps:$4 sm:$0xff]  }
 0x21e   :  { %5519 = vmatprep.subr.bf16.mxu1 %v6374_v47  ;;  %v6396_v47 = vld [vmem:[#allocation10 + $0x458] ss:$12 sps:$4 sm:$0xff]  }
 0x21f   :  { %v2407_v61 = vpop.f32.mrf.mxu0  ;;  %4594 = vmatmul.mubr.bf16.vlgmr.msra.gmra.mxu0 %v6790_v50 }
 0x220   :  { %v2364_v56 = vpop.f32.mrf.mxu1  ;;  %5498 = vmatpush3.bf16.msra.mxu0 %v6358_v16  ;;  %4679 = vmatprep.mubr.bf16.mxu0 %v6711_v22  ;;  %v6397_v16 = vld [vmem:[#allocation10 + $0x398] ss:$12 sps:$4 sm:$0xff]  }
 0x221   :  { %v2409_v58 = vpop.f32.mrf.mxu0  ;;  %5499 = vmatprep.subr.bf16.mxu0 %v6362_v24  ;;  %v2365_v12 = vadd.f32 %v2364_v56, %v427_v52  ;;  %v6398_v24 = vld [vmem:[#allocation10 + $0x260] ss:$12 sps:$4 sm:$0xff]  }
 0x222   :  { %v2366_v57 = vpop.f32.mrf.mxu1  ;;  %v6401_v56 = vld [vmem:[#allocation10 + $0x380] ss:$12 sps:$4 sm:$0xff]  }
 0x223   :  { %v2367_v59 = vadd.f32 %v2366_v57, %v431_v43  ;;  %v2411_v15 = vpop.f32.mrf.mxu0  ;;  %v2408_v7 = vadd.f32 %v2407_v61, %v2365_v12  ;;  %v6402_v61 = vld [vmem:[#allocation10 + $0x248] ss:$12 sps:$4 sm:$0xff]   ;;  %v6410_v12 = vld [vmem:[#allocation10 + $0x5d8] ss:$12 sps:$4 sm:$0xff]  }
 0x224   :  { %v2368_v60 = vpop.f32.mrf.mxu1  ;;  %5500 = vmatpush3.bf16.msra.mxu0 %v6363_v34  ;;  %v6404_v34 = vld [vmem:[#allocation10 + $0x428] ss:$12 sps:$4 sm:$0xff]  }
 0x225   :  { %v2369_v62 = vadd.f32 %v2368_v60, %v427_v52  ;;  %5501 = vmatprep.subr.bf16.mxu0 %v6367_v4  ;;  %v2410_v2 = vadd.f32 %v2409_v58, %v2367_v59  ;;  %v2413_v22 = vpop.f32.mrf.mxu0  ;;  %v2426_v20 = vmax.f32 %v2408_v7, 0.0  ;;  %v6399_v52 = vld [vmem:[#allocation10 + $0x1a0] ss:$12 sps:$4 sm:$0xff]   ;;  %v6405_v57 = vld [vmem:[#allocation10 + $0x368] ss:$12 sps:$4 sm:$0xff]  }
 0x226   :  { %v2370_v45 = vpop.f32.mrf.mxu1  ;;  %v6406_v58 = vld [vmem:[#allocation10 + $0x5f0] ss:$12 sps:$4 sm:$0xff]   ;;  %v6411_v60 = vld [vmem:[#allocation10 + $0x3f8] ss:$12 sps:$4 sm:$0xff]  }
 0x227   :  { %v2412_v3 = vadd.f32 %v2411_v15, %v2369_v62  ;;  %v2371_v5 = vadd.f32 %v2370_v45, %v431_v43  ;;  %v2427_v13 = vmax.f32 %v2410_v2, 0.0  ;;  %v6400_v43 = vld [vmem:[#allocation10 + $0x440] ss:$12 sps:$4 sm:$0xff]   ;;  %v6408_v4 = vld [vmem:[#allocation10 + $0x530] ss:$12 sps:$4 sm:$0xff]  }
 0x228   :  { %5502 = vmatpush3.bf16.msra.mxu0 %v6368_v53  ;;  %v6409_v59 = vld [vmem:[#allocation10 + $0x350] ss:$12 sps:$4 sm:$0xff]   ;;  %v6412_v15 = vld [vmem:[#allocation10 + $0x518] ss:$12 sps:$4 sm:$0xff]   ;;  %v6414_v53 = vld [vmem:[#allocation10 + $0x5c0] ss:$12 sps:$4 sm:$0xff]  }
 0x229   :  { %v2414_v8 = vadd.f32 %v2413_v22, %v2371_v5  ;;  %v2438_v10 = vmax.f32 %v2412_v3, 0.0  ;;  %5503 = vmatprep.subr.bf16.mxu0 %v6372_v55  ;;  %v6413_v62 = vld [vmem:[#allocation10 + $0x338] ss:$12 sps:$4 sm:$0xff]   ;;  %v6415_v45 = vld [vmem:[#allocation10 + $0x3e0] ss:$12 sps:$4 sm:$0xff]  }
 0x22a   :  { %v6416_v55 = vld [vmem:[#allocation10 + $0x500] ss:$12 sps:$4 sm:$0xff]   ;;  %v6418_v3 = vld [vmem:[#allocation10 + $0x5a8] ss:$12 sps:$4 sm:$0xff]   ;;  %v6422_v7 = vld [vmem:[#allocation10 + $0x590] ss:$12 sps:$4 sm:$0xff]  }
 0x22b   :  { %v2439_v14 = vmax.f32 %v2414_v8, 0.0  ;;  %v6801_v35 = vpack.c.bf16 %v2438_v10, %v2426_v20  ;;  %v6417_v2 = vld [vmem:[#allocation10 + $0x320] ss:$12 sps:$4 sm:$0xff]   ;;  %v6419_v5 = vld [vmem:[#allocation10 + $0x3c8] ss:$12 sps:$4 sm:$0xff]  }
 0x22c   :  { %5504 = vmatpush3.bf16.msra.mxu0 %v6373_v9  ;;  %v6424_v22 = vld [vmem:[#allocation10 + $0x770] ss:$12 sps:$4 sm:$0xff]   ;;  %v6426_v10 = vld [vmem:[#allocation10 + $0x578] ss:$12 sps:$4 sm:$0xff]   ;;  %v6430_v20 = vld [vmem:[#allocation10 + $0x560] ss:$12 sps:$4 sm:$0xff]  }
 0x22d   :  { %v6799_v21 = vpack.c.bf16 %v2439_v14, %v2427_v13  ;;  %5505 = vmatprep.subr.bf16.mxu0 %v6375_v11  ;;  %v6423_v8 = vld [vmem:[#allocation10 + $0x4d0] ss:$12 sps:$4 sm:$0xff]   ;;  %v6428_v11 = vld [vmem:[#allocation10 + $0x758] ss:$12 sps:$4 sm:$0xff]  }
 0x22e   :  { %v6425_v9 = vld [vmem:[#allocation10 + $0x6b0] ss:$12 sps:$4 sm:$0xff]   ;;  %v6427_v13 = vld [vmem:[#allocation10 + $0x4b8] ss:$12 sps:$4 sm:$0xff]  }
 0x22f   :  { %4636 = vmatprep.mubr.bf16.mxu1 %v6799_v21  ;;  %v6429_v14 = vld [vmem:[#allocation10 + $0x698] ss:$12 sps:$4 sm:$0xff]  }
 0x230   :  { %4637 = vmatmul.mubr.bf16.vlgmr.msra.gmra.mxu1 %v6801_v35  ;;  %5506 = vmatpush3.bf16.msra.mxu0 %v6377_v6  ;;  %v6431_v6 = vld [vmem:[#allocation10 + $0x4a0] ss:$12 sps:$4 sm:$0xff]  }
 0x231   :  { %5520 = vmatpush3.bf16.msra.mxu1 %v6376_v23  ;;  %4720 = vmatprep.mubr.bf16.mxu1 %v6727_v48  ;;  %v6392_v48 = vld [vmem:[#allocation10 + $0x470] ss:$12 sps:$4 sm:$0xff]   ;;  %v6432_v23 = vld [vmem:[#allocation10 + $0x740] ss:$12 sps:$4 sm:$0xff]  }
 0x232   :  { %5521 = vmatprep.subr.bf16.mxu1 %v6378_v27  ;;  %5507 = vmatprep.subr.bf16.mxu0 %v6379_v28  ;;  %v6433_v27 = vld [vmem:[#allocation10 + $0x680] ss:$12 sps:$4 sm:$0xff]   ;;  %v6434_v28 = vld [vmem:[#allocation10 + $0x548] ss:$12 sps:$4 sm:$0xff]  }
 0x234   :  { %5508 = vmatpush3.bf16.msra.mxu0 %v6381_v31  ;;  %v6437_v31 = vld [vmem:[#allocation10 + $0x668] ss:$12 sps:$4 sm:$0xff]  }
 0x235   :  { %5522 = vmatpush3.bf16.msra.mxu1 %v6380_v29  ;;  %5509 = vmatprep.subr.bf16.mxu0 %v6383_v17  ;;  %v6436_v29 = vld [vmem:[#allocation10 + $0x728] ss:$12 sps:$4 sm:$0xff]   ;;  %v6440_v17 = vld [vmem:[#allocation10 + $0x830] ss:$12 sps:$4 sm:$0xff]  }
 0x236   :  { %5523 = vmatprep.subr.bf16.mxu1 %v6382_v26  ;;  %v6438_v26 = vld [vmem:[#allocation10 + $0x8f0] ss:$12 sps:$4 sm:$0xff]  }
 0x238   :  { %5510 = vmatpush3.bf16.msra.mxu0 %v6385_v37  ;;  %v6442_v37 = vld [vmem:[#allocation10 + $0x8d8] ss:$12 sps:$4 sm:$0xff]  }
 0x239   :  { %5524 = vmatpush3.bf16.msra.mxu1 %v6384_v36  ;;  %5511 = vmatprep.subr.bf16.mxu0 %v6387_v39  ;;  %v6441_v36 = vld [vmem:[#allocation10 + $0x650] ss:$12 sps:$4 sm:$0xff]   ;;  %v6444_v39 = vld [vmem:[#allocation10 + $0x818] ss:$12 sps:$4 sm:$0xff]  }
 0x23a   :  { %5525 = vmatprep.subr.bf16.mxu1 %v6386_v38  ;;  %v6443_v38 = vld [vmem:[#allocation10 + $0x6f8] ss:$12 sps:$4 sm:$0xff]  }
 0x23c   :  { %5512 = vmatpush3.bf16.msra.mxu0 %v6389_v41  ;;  %v6446_v41 = vld [vmem:[#allocation10 + $0x8c0] ss:$12 sps:$4 sm:$0xff]  }
 0x23d   :  { %5526 = vmatpush3.bf16.msra.mxu1 %v6388_v40  ;;  %5541 = vmatprep.subr.bf16.mxu0 %v6392_v48  ;;  %v6445_v40 = vld [vmem:[#allocation10 + $0x638] ss:$12 sps:$4 sm:$0xff]   ;;  %v6448_v48 = vld [vmem:[#allocation10 + $0x800] ss:$12 sps:$4 sm:$0xff]  }
 0x23e   :  { %5527 = vmatprep.subr.bf16.mxu1 %v6390_v42  ;;  %v6447_v42 = vld [vmem:[#allocation10 + $0x6e0] ss:$12 sps:$4 sm:$0xff]  }
 0x23f   :  { %4680 = vmatmul.mubr.bf16.vlgmr.msra.gmra.mxu0 %v6702_v0  ;;  %v6403_v0 = vld [vmem:[#allocation10 + $0x188] ss:$12 sps:$4 sm:$0xff]  }
 0x240   :  { %5542 = vmatpush3.bf16.msra.mxu0 %v6393_v46  ;;  %4761 = vmatprep.mubr.bf16.mxu0 %v6753_v30  ;;  %v6407_v30 = vld [vmem:[#allocation10 + $0x410] ss:$12 sps:$4 sm:$0xff]   ;;  %v6450_v46 = vld [vmem:[#allocation10 + $0x8a8] ss:$12 sps:$4 sm:$0xff]  }
 0x241   :  { %5528 = vmatpush3.bf16.msra.mxu1 %v6391_v44  ;;  %5543 = vmatprep.subr.bf16.mxu0 %v6396_v47  ;;  %v6449_v44 = vld [vmem:[#allocation10 + $0x620] ss:$12 sps:$4 sm:$0xff]   ;;  %v6454_v47 = vld [vmem:[#allocation10 + $0x890] ss:$12 sps:$4 sm:$0xff]  }
 0x242   :  { %5529 = vmatprep.subr.bf16.mxu1 %v6394_v33  ;;  %v6451_v33 = vld [vmem:[#allocation10 + $0x6c8] ss:$12 sps:$4 sm:$0xff]  }
 0x244   :  { %5544 = vmatpush3.bf16.msra.mxu0 %v6397_v16  ;;  %v6456_v16 = vld [vmem:[#allocation10 + $0x878] ss:$12 sps:$4 sm:$0xff]  }
 0x245   :  { %5530 = vmatpush3.bf16.msra.mxu1 %v6395_v49  ;;  %5545 = vmatprep.subr.bf16.mxu0 %v6400_v43  ;;  %v6455_v49 = vld [vmem:[#allocation10 + $0x7d0] ss:$12 sps:$4 sm:$0xff]   ;;  %v6458_v43 = vld [vmem:[#allocation10 + $0x860] ss:$12 sps:$4 sm:$0xff]  }
 0x246   :  { %5531 = vmatprep.subr.bf16.mxu1 %v6398_v24  ;;  %v6457_v24 = vld [vmem:[#allocation10 + $0x7b8] ss:$12 sps:$4 sm:$0xff]  }
 0x248   :  { %5546 = vmatpush3.bf16.msra.mxu0 %v6401_v56  ;;  %v6460_v56 = vld [vmem:[#allocation10 + $0x848] ss:$12 sps:$4 sm:$0xff]  }
 0x249   :  { %5532 = vmatpush3.bf16.msra.mxu1 %v6399_v52  ;;  %5547 = vmatprep.subr.bf16.mxu0 %v6404_v34  ;;  %v6459_v52 = vld [vmem:[#allocation10 + $0x7a0] ss:$12 sps:$4 sm:$0xff]  }
 0x24a   :  { %5533 = vmatprep.subr.bf16.mxu1 %v6402_v61  ;;  %v6461_v61 = vld [vmem:[#allocation10 + $0x788] ss:$12 sps:$4 sm:$0xff]  }
 0x24c   :  { %5548 = vmatpush3.bf16.msra.mxu0 %v6405_v57 }
 0x24d   :  { %5534 = vmatpush3.bf16.msra.mxu1 %v6403_v0  ;;  %5549 = vmatprep.subr.bf16.mxu0 %v6407_v30 }
 0x24e   :  { %5563 = vmatprep.subr.bf16.mxu1 %v6406_v58 }
 0x250   :  { %4721 = vmatmul.mubr.bf16.vlgmr.msra.gmra.mxu1 %v6742_v25  ;;  %5550 = vmatpush3.bf16.msra.mxu0 %v6409_v59  ;;  %v6420_v25 = vld [vmem:[#allocation10 + $0x4e8] ss:$12 sps:$4 sm:$0xff]   ;;  %v6816_v59 = vld [vmem:[#allocation12] sm:$0x7] }
 0x251   :  { %5564 = vmatpush3.bf16.msra.mxu1 %v6408_v4  ;;  %4802 = vmatprep.mubr.bf16.mxu1 %v6763_v32  ;;  %v6421_v32 = vld [vmem:[#allocation10 + $0x308] ss:$12 sps:$4 sm:$0xff]  }
 0x252   :  { %5565 = vmatprep.subr.bf16.mxu1 %v6410_v12  ;;  %5551 = vmatprep.subr.bf16.mxu0 %v6411_v60 }
 0x254   :  { %5552 = vmatpush3.bf16.msra.mxu0 %v6413_v62 }
 0x255   :  { %5566 = vmatpush3.bf16.msra.mxu1 %v6412_v15  ;;  %5553 = vmatprep.subr.bf16.mxu0 %v6415_v45  ;;  %v2841_v15 = vrot.slane %v6816_v59, %v6692_v18  ;;  %v2845_v45 = vrot.slane %v6816_v59, %v6705_v54 }
 0x256   :  { %5567 = vmatprep.subr.bf16.mxu1 %v6414_v53 }
 0x258   :  { %5554 = vmatpush3.bf16.msra.mxu0 %v6417_v2 }
 0x259   :  { %5568 = vmatpush3.bf16.msra.mxu1 %v6416_v55  ;;  %5555 = vmatprep.subr.bf16.mxu0 %v6419_v5 }
 0x25a   :  { %5569 = vmatprep.subr.bf16.mxu1 %v6418_v3 }
 0x25c   :  { %5556 = vmatpush3.bf16.msra.mxu0 %v6421_v32 }
 0x25d   :  { %5570 = vmatpush3.bf16.msra.mxu1 %v6420_v25  ;;  %5585 = vmatprep.subr.bf16.mxu0 %v6424_v22 }
 0x25e   :  { %5571 = vmatprep.subr.bf16.mxu1 %v6422_v7 }
 0x25f   :  { %4762 = vmatmul.mubr.bf16.vlgmr.msra.gmra.mxu0 %v6772_v63  ;;  %v6435_v63 = vld [vmem:[#allocation10 + $0x488] ss:$12 sps:$4 sm:$0xff]   ;;  %v4423_v34 = vpop.f32.mrf.mxu0 }
 0x260   :  { %5586 = vmatpush3.bf16.msra.mxu0 %v6425_v9  ;;  %4843 = vmatprep.mubr.bf16.mxu0 %v6784_v19  ;;  %v6439_v19 = vld [vmem:[#allocation10 + $0x710] ss:$12 sps:$4 sm:$0xff]   ;;  %v4466_v58 = vpop.f32.mrf.mxu1  ;;  %v4424_v55 = vadd.f32 %v4423_v34, %v2841_v15 }
 0x261   :  { %5572 = vmatpush3.bf16.msra.mxu1 %v6423_v8  ;;  %5587 = vmatprep.subr.bf16.mxu0 %v6428_v11  ;;  %v4425_v0 = vpop.f32.mrf.mxu0 }
 0x262   :  { %5573 = vmatprep.subr.bf16.mxu1 %v6426_v10  ;;  %v4426_v3 = vadd.f32 %v4425_v0, %v2845_v45  ;;  %v4467_v32 = vadd.f32 %v4466_v58, %v4424_v55  ;;  %v2849_v58 = vrot.slane %v6816_v59, %v6731_v51 }
 0x263   :  { %v4427_v57 = vpop.f32.mrf.mxu0 }
 0x264   :  { %5588 = vmatpush3.bf16.msra.mxu0 %v6429_v14  ;;  %v4428_v7 = vadd.f32 %v4427_v57, %v2841_v15 }
 0x265   :  { %5574 = vmatpush3.bf16.msra.mxu1 %v6427_v13  ;;  %5589 = vmatprep.subr.bf16.mxu0 %v6432_v23  ;;  %v4429_v30 = vpop.f32.mrf.mxu0 }
 0x266   :  { %5575 = vmatprep.subr.bf16.mxu1 %v6430_v20  ;;  %v4430_v8 = vadd.f32 %v4429_v30, %v2845_v45 }
 0x268   :  { %5590 = vmatpush3.bf16.msra.mxu0 %v6433_v27 }
 0x269   :  { %5576 = vmatpush3.bf16.msra.mxu1 %v6431_v6  ;;  %5591 = vmatprep.subr.bf16.mxu0 %v6436_v29 }
 0x26a   :  { %5577 = vmatprep.subr.bf16.mxu1 %v6434_v28 }
 0x26c   :  { %5592 = vmatpush3.bf16.msra.mxu0 %v6437_v31 }
 0x26d   :  { %5578 = vmatpush3.bf16.msra.mxu1 %v6435_v63  ;;  %5593 = vmatprep.subr.bf16.mxu0 %v6439_v19 }
 0x26e   :  { %5607 = vmatprep.subr.bf16.mxu1 %v6438_v26 }
 0x270   :  { %4803 = vmatmul.mubr.bf16.vlgmr.msra.gmra.mxu1 %v6774_v1  ;;  %5594 = vmatpush3.bf16.msra.mxu0 %v6441_v36  ;;  %v6452_v1 = vld [vmem:[#allocation10 + $0x7e8] ss:$12 sps:$4 sm:$0xff]  }
 0x271   :  { %5608 = vmatpush3.bf16.msra.mxu1 %v6440_v17  ;;  %4884 = vmatprep.mubr.bf16.mxu1 %v6799_v21  ;;  %v6453_v21 = vld [vmem:[#allocation10 + $0x608] ss:$12 sps:$4 sm:$0xff]  }
 0x272   :  { %5609 = vmatprep.subr.bf16.mxu1 %v6442_v37  ;;  %5595 = vmatprep.subr.bf16.mxu0 %v6443_v38 }
 0x274   :  { %5596 = vmatpush3.bf16.msra.mxu0 %v6445_v40 }
 0x275   :  { %5610 = vmatpush3.bf16.msra.mxu1 %v6444_v39  ;;  %5597 = vmatprep.subr.bf16.mxu0 %v6447_v42 }
 0x276   :  { %5611 = vmatprep.subr.bf16.mxu1 %v6446_v41 }
 0x278   :  { %5598 = vmatpush3.bf16.msra.mxu0 %v6449_v44 }
 0x279   :  { %5612 = vmatpush3.bf16.msra.mxu1 %v6448_v48  ;;  %5599 = vmatprep.subr.bf16.mxu0 %v6451_v33 }
 0x27a   :  { %5613 = vmatprep.subr.bf16.mxu1 %v6450_v46 }
 0x27c   :  { %5600 = vmatpush3.bf16.msra.mxu0 %v6453_v21 }
 0x27d   :  { %5614 = vmatpush3.bf16.msra.mxu1 %v6452_v1 }
 0x27e   :  { %5615 = vmatprep.subr.bf16.mxu1 %v6454_v47 }
 0x27f   :  { %4844 = vmatmul.mubr.bf16.vlgmr.msra.gmra.mxu0 %v6790_v50  ;;  %v4468_v50 = vpop.f32.mrf.mxu1 }
 0x280   :  { %v4469_v22 = vadd.f32 %v4468_v50, %v4426_v3 }
 0x281   :  { %5616 = vmatpush3.bf16.msra.mxu1 %v6455_v49  ;;  %v4470_v12 = vpop.f32.mrf.mxu1 }
 0x282   :  { %5617 = vmatprep.subr.bf16.mxu1 %v6456_v16  ;;  %v4471_v13 = vadd.f32 %v4470_v12, %v4428_v7 }
 0x283   :  { %v4472_v62 = vpop.f32.mrf.mxu1 }
 0x284   :  { %v4473_v14 = vadd.f32 %v4472_v62, %v4430_v8 }
 0x285   :  { %5618 = vmatpush3.bf16.msra.mxu1 %v6457_v24 }
 0x286   :  { %5619 = vmatprep.subr.bf16.mxu1 %v6458_v43 }
 0x289   :  { %5620 = vmatpush3.bf16.msra.mxu1 %v6459_v52 }
 0x28a   :  { %5621 = vmatprep.subr.bf16.mxu1 %v6460_v56 }
 0x28d   :  { %5622 = vmatpush3.bf16.msra.mxu1 %v6461_v61 }
 0x290   :  { %4885 = vmatmul.mubr.bf16.vlgmr.msra.gmra.mxu1 %v6801_v35 }
 0x29f   :  { %v4509_v4 = vpop.f32.mrf.mxu0 }
 0x2a0   :  { %v4552_v35 = vpop.f32.mrf.mxu1  ;;  %v4510_v9 = vadd.f32 %v4509_v4, %v4467_v32 }
 0x2a1   :  { %v4511_v60 = vpop.f32.mrf.mxu0 }
 0x2a2   :  { %v4554_v5 = vpop.f32.mrf.mxu1  ;;  %v4512_v18 = vadd.f32 %v4511_v60, %v4469_v22  ;;  %v4553_v20 = vadd.f32 %v4552_v35, %v4510_v9 }
 0x2a3   :  { %v4513_v53 = vpop.f32.mrf.mxu0 }
 0x2a4   :  { %v4556_v10 = vpop.f32.mrf.mxu1  ;;  %v4514_v23 = vadd.f32 %v4513_v53, %v4471_v13  ;;  %v4555_v27 = vadd.f32 %v4554_v5, %v4512_v18 }
 0x2a5   :  { %v4515_v2 = vpop.f32.mrf.mxu0 }
 0x2a6   :  { %v4558_v6 = vpop.f32.mrf.mxu1  ;;  %v4516_v28 = vadd.f32 %v4515_v2, %v4473_v14  ;;  %v4557_v31 = vadd.f32 %v4556_v10, %v4514_v23 }
 0x2a8   :  { %v4559_v37 = vadd.f32 %v4558_v6, %v4516_v28 }
 0x2df   :  { %v4595_v25 = vpop.f32.mrf.mxu0 }
 0x2e0   :  { %v4596_v29 = vadd.f32 %v4595_v25, %v4553_v20 }
 0x2e1   :  { %v4597_v11 = vpop.f32.mrf.mxu0 }
 0x2e2   :  { %v4598_v26 = vadd.f32 %v4597_v11, %v4555_v27 }
 0x2e3   :  { %v4599_v54 = vpop.f32.mrf.mxu0 }
 0x2e4   :  { %v4600_v38 = vadd.f32 %v4599_v54, %v4557_v31 }
 0x2e5   :  { %v4601_v17 = vpop.f32.mrf.mxu0 }
 0x2e6   :  { %v4602_v41 = vadd.f32 %v4601_v17, %v4559_v37 }
 0x2f0   :  { %v4638_v63 = vpop.f32.mrf.mxu1 }
 0x2f1   :  { %v4639_v19 = vadd.f32 %v4638_v63, %v4596_v29 }
 0x2f2   :  { %v4640_v36 = vpop.f32.mrf.mxu1 }
 0x2f3   :  { %4893 = vst [vmem:[#allocation13] sm:$0xff] %v4639_v19  ;;  %v4641_v39 = vadd.f32 %v4640_v36, %v4598_v26 }
 0x2f4   :  { %v4642_v40 = vpop.f32.mrf.mxu1 }
 0x2f5   :  { %4894 = vst [vmem:[#allocation13 + $0x8] sm:$0xff] %v4641_v39  ;;  %v4643_v42 = vadd.f32 %v4642_v40, %v4600_v38 }
 0x2f6   :  { %v4644_v48 = vpop.f32.mrf.mxu1 }
 0x2f7   :  { %4896 = vst [vmem:[#allocation13 + $0x18] sm:$0xff] %v4643_v42  ;;  %v4645_v44 = vadd.f32 %v4644_v48, %v4602_v41 }
 0x2f9   :  { %4897 = vst [vmem:[#allocation13 + $0x20] sm:$0xff] %v4645_v44 }
 0x2ff   :  { %v5513_v46 = vpop.f32.mrf.mxu0 }
 0x301   :  { %v5514_v33 = vpop.f32.mrf.mxu0 }
 0x302   :  { %v5515_v30 = vadd.f32 %v5514_v33, %v5513_v46 }
 0x303   :  { %v5516_v1 = vpop.f32.mrf.mxu0 }
 0x304   :  { %v4682_v60 = vadd.f32 %v5515_v30, %v2849_v58 }
 0x305   :  { %v5517_v21 = vpop.f32.mrf.mxu0 }
 0x306   :  { %v5518_v15 = vadd.f32 %v5517_v21, %v5516_v1 }
 0x308   :  { %v4685_v3 = vadd.f32 %v5518_v15, %v2849_v58 }
 0x310   :  { %v5535_v47 = vpop.f32.mrf.mxu1 }
 0x312   :  { %v5536_v16 = vpop.f32.mrf.mxu1 }
 0x313   :  { %v5537_v4 = vadd.f32 %v5536_v16, %v5535_v47 }
 0x314   :  { %v5538_v43 = vpop.f32.mrf.mxu1 }
 0x315   :  { %v4723_v45 = vadd.f32 %v5537_v4, %v4682_v60 }
 0x316   :  { %v5539_v56 = vpop.f32.mrf.mxu1 }
 0x317   :  { %v5540_v35 = vadd.f32 %v5539_v56, %v5538_v43 }
 0x319   :  { %v4726_v8 = vadd.f32 %v5540_v35, %v4685_v3 }
 0x31f   :  { %v5557_v49 = vpop.f32.mrf.mxu0 }
 0x321   :  { %v5558_v24 = vpop.f32.mrf.mxu0 }
 0x322   :  { %v5559_v62 = vadd.f32 %v5558_v24, %v5557_v49 }
 0x323   :  { %v5560_v52 = vpop.f32.mrf.mxu0 }
 0x324   :  { %v4764_v5 = vadd.f32 %v5559_v62, %v4723_v45 }
 0x325   :  { %v5561_v61 = vpop.f32.mrf.mxu0 }
 0x326   :  { %v5562_v25 = vadd.f32 %v5561_v61, %v5560_v52 }
 0x328   :  { %v4767_v10 = vadd.f32 %v5562_v25, %v4726_v8 }
 0x330   :  { %v5579_v34 = vpop.f32.mrf.mxu1 }
 0x332   :  { %v5580_v57 = vpop.f32.mrf.mxu1 }
 0x333   :  { %v5581_v55 = vadd.f32 %v5580_v57, %v5579_v34 }
 0x334   :  { %v5582_v12 = vpop.f32.mrf.mxu1 }
 0x335   :  { %v4805_v51 = vadd.f32 %v5581_v55, %v4764_v5 }
 0x336   :  { %v5583_v2 = vpop.f32.mrf.mxu1 }
 0x337   :  { %v5584_v59 = vadd.f32 %v5583_v2, %v5582_v12 }
 0x339   :  { %v4808_v20 = vadd.f32 %v5584_v59, %v4767_v10 }
 0x33f   :  { %v5601_v0 = vpop.f32.mrf.mxu0 }
 0x341   :  { %v5602_v50 = vpop.f32.mrf.mxu0 }
 0x342   :  { %v5603_v32 = vadd.f32 %v5602_v50, %v5601_v0 }
 0x343   :  { %v5604_v53 = vpop.f32.mrf.mxu0 }
 0x344   :  { %v4846_v11 = vadd.f32 %v5603_v32, %v4805_v51 }
 0x345   :  { %v5605_v7 = vpop.f32.mrf.mxu0 }
 0x346   :  { %v5606_v13 = vadd.f32 %v5605_v7, %v5604_v53 }
 0x348   :  { %v4849_v54 = vadd.f32 %v5606_v13, %v4808_v20 }
 0x350   :  { %v5623_v22 = vpop.f32.mrf.mxu1 }
 0x352   :  { %v5624_v9 = vpop.f32.mrf.mxu1 }
 0x353   :  { %v5625_v18 = vadd.f32 %v5624_v9, %v5623_v22 }
 0x354   :  { %v5626_v14 = vpop.f32.mrf.mxu1 }
 0x355   :  { %v4887_v23 = vadd.f32 %v5625_v18, %v4846_v11 }
 0x356   :  { %v5627_v6 = vpop.f32.mrf.mxu1 }
 0x357   :  { %4895 = vst [vmem:[#allocation13 + $0x10] sm:$0xff] %v4887_v23  ;;  %v5628_v27 = vadd.f32 %v5627_v6, %v5626_v14 }
 0x359   :  { %v4890_v28 = vadd.f32 %v5628_v27, %v4849_v54 }
 0x35b   :  { %4898 = vst [vmem:[#allocation13 + $0x28] sm:$0xff] %v4890_v28 }
 0x35c   :  { %6577 = shalt.err (!%p6574_p1)
}
 0x35d   :  { %s6605_s23 = smov 384   ;;  %s6606_s24 = smov 24  }
 0x35e   :  { %4910 = dma.vmem_to_hbm [thread:$0]  %s4905_s5, 768, %s6833_s6, [#allocation6], %s6605_s23, %s6605_s23, %s6606_s24  }
 0x35f   :  { %6592 = dma.done.wait [#allocation6], 768  }
 0x360   :  { %6593 = vsyncadd [#allocation6], 4294966528 }
 0x361   :  { %4914 = vsyncpa [#allocation5], 1 }
 0x362   :  { %4915 = vsyncpa [#allocation8], 1 }
 0x363   :  { %4916 = vsyncpa [#allocation11], 1 }
 0x364   :  { %4917 = vsyncpa [#allocation6], 1 }

</bundles_post_ra>
